<compile_context>
chip_gen: v7x
topology: tpu7x:2x2x1
jax: 0.10.0
libtpu: 0.0.40
codegen_flags: <defaults>
</compile_context>

<pallas_src>
import jax
import jax.numpy as jnp
from jax.experimental import pallas as pl
from jax.experimental.pallas import tpu as pltpu

# ---------------- model hyper-parameters (from setup_config / defaults) -----
VOCAB_SIZE = 32
EMBEDDING_DIM = 8
MAX_NORM = 2.0
HIDDEN_DIM = 8
DENSE_DIM = 32
WINDOW_SIZE = 8   # T (sequence length of the input window)
BATCH = 4         # n_samples

V, E, H, D, T, B = VOCAB_SIZE, EMBEDDING_DIM, HIDDEN_DIM, DENSE_DIM, WINDOW_SIZE, BATCH
TB = T * B
G = 4 * H          # gate width (i|f|g|o) = 32

# ----------------- lane-dense packed-parameter layout (one (32,128) buffer) --
# lanes [    0,   G): proj_table (V, 4H) = renorm(emb) @ w_ih + b_lstm, g-cols x2
# lanes [    G,  2G): w_hh       (H, 4H) rows 0:H,                     g-cols x2
# lanes [   2G, 2G+V): W_head    (H, V)  rows 0:H  = w1 @ w2
# lanes [ 2G+V, 2G+2V): b_head   (1, V)  row 0     = b1 @ w2 + b2
PACK_ROWS = V      # 32
PACK_W = 128       # full lane width -> unmasked DMA / unmasked vregs


# ---------------------------- Pallas kernel ---------------------------------
def net_kernel(x_ref, pp_ref, hc_ref, out_ref):
    """Fused forward: one-hot-MXU embedding+input-projection, fully-unrolled
    LSTM recurrence with VPU broadcast-MAC, fused dense head."""
    pp = pp_ref[...]                                   # (32, 128) single unmasked load
    proj_table = pp[:, 0:G]                            # (V, 4H)
    w_hh = pp[0:H, G:2 * G]                            # (H, 4H)   (g-cols pre-scaled x2)
    w_head = pp[0:H, 2 * G:2 * G + V]                  # (H, V)
    b_head = pp[0:1, 2 * G + V:2 * G + 2 * V]          # (1, V)

    # ---- embedding gather + max_norm + input projection as ONE MXU matmul ----
    ids = x_ref[...]                                   # (T*B, 1) int32, time-major
    onehot = (ids == jax.lax.broadcasted_iota(jnp.int32, (TB, V), 1)).astype(jnp.float32)
    xproj = jnp.dot(onehot, proj_table,
                    preferred_element_type=jnp.float32)       # (T*B, 4H), bias folded

    h = hc_ref[:, 0:H]                                 # (B, H)
    c = hc_ref[:, H:2 * H]                             # (B, H)

    # ---- fully unrolled recurrence (gate order [i, f, g, o], PyTorch layout) ----
    for t in range(T):
        gates = xproj[t * B:(t + 1) * B, :]            # (B, 4H)
        for k in range(H):                             # h @ w_hh as broadcast-MACs
            gates = gates + h[:, k:k + 1] * w_hh[k:k + 1, :]
        s = jax.nn.sigmoid(gates)                      # EUP pass 1: all 4 gates at once
        i = s[:, 0 * H:1 * H]
        f = s[:, 1 * H:2 * H]
        g = 2.0 * s[:, 2 * H:3 * H] - 1.0              # tanh via pre-scaled sigmoid
        o = s[:, 3 * H:4 * H]
        c = f * c + i * g
        h = o * jnp.tanh(c)                            # EUP pass 2

    # ---- head: h.mean(dim=0) with n_layers == 1 is h; fused Linear1+Linear2 ----
    logits = jnp.dot(h, w_head, preferred_element_type=jnp.float32) + b_head  # (B, V)

    # direct static-slice stores (no concat): [logits | h | c]
    out_ref[:, 0:V] = logits
    out_ref[:, V:V + H] = h
    out_ref[:, V + H:V + 2 * H] = c


# ------------------------------ wrapper --------------------------------------
def net_forward(x, params, h=None, c=None):
    """x: (B, T) int token indices. Returns (logits (B,V), h (1,B,H), c (1,B,H))."""
    Bx, Tx = x.shape
    assert (Bx, Tx) == (B, T)

    # Time-major flat token column (row = t*B + b) so each unrolled step uses a
    # contiguous leading-axis slice of the precomputed input projection.
    x_tm = x.astype(jnp.int32).T.reshape(TB, 1)

    if h is None or c is None:
        hc = jnp.zeros((B, 2 * H), jnp.float32)
    else:
        hc = jnp.concatenate([h[0], c[0]], axis=-1)

    vmem = pl.BlockSpec(memory_space=pltpu.MemorySpace.VMEM)
    out = pl.pallas_call(
        net_kernel,
        out_shape=jax.ShapeDtypeStruct((B, V + 2 * H), jnp.float32),
        in_specs=[vmem, vmem, vmem],
        out_specs=vmem,
    )(x_tm, params["packed"], hc)

    logits = out[:, 0:V]
    h_out = out[:, V:V + H]
    c_out = out[:, V + H:V + 2 * H]
    # PyTorch LSTM hidden states carry a leading n_layers axis.
    return logits, h_out[None], c_out[None]


# ------------------------- parameter packing / init ---------------------------
def pack_params(p):
    """Fold max_norm renorm, input projection + LSTM biases, head fusion and the
    tanh-through-sigmoid x2 gate scaling into one lane-dense (32,128) buffer.
    (Forward-exact; PyTorch's in-place max_norm weight mutation is training-only.)"""
    emb = p["emb_table"]
    norm = jnp.sqrt(jnp.sum(emb * emb, axis=-1, keepdims=True))
    emb_renorm = emb * jnp.where(norm > MAX_NORM, MAX_NORM / (norm + 1e-7), 1.0)

    proj_table = emb_renorm @ p["w_ih"] + p["b_lstm"]            # (V, 4H)
    proj_table = proj_table.at[:, 2 * H:3 * H].multiply(2.0)     # pre-scale g cols
    w_hh = p["w_hh"].at[:, 2 * H:3 * H].multiply(2.0)            # pre-scale g cols

    w_head = p["w1"] @ p["w2"]                                   # (H, V)
    b_head = p["b1"] @ p["w2"] + p["b2"]                         # (1, V)

    packed = jnp.zeros((PACK_ROWS, PACK_W), jnp.float32)
    packed = packed.at[0:V, 0:G].set(proj_table)
    packed = packed.at[0:H, G:2 * G].set(w_hh)
    packed = packed.at[0:H, 2 * G:2 * G + V].set(w_head)
    packed = packed.at[0:1, 2 * G + V:2 * G + 2 * V].set(b_head)
    return packed


def init_params(key):
    ks = jax.random.split(key, 8)

    emb_table = jax.random.normal(ks[0], (V, E), jnp.float32)
    emb_table = emb_table.at[V - 1].set(0.0)                 # padding_idx = V-1

    k = 1.0 / jnp.sqrt(H)
    w_ih = jax.random.uniform(ks[1], (E, 4 * H), jnp.float32, -k, k)
    w_hh = jax.random.uniform(ks[2], (H, 4 * H), jnp.float32, -k, k)
    b_lstm = jax.random.uniform(ks[3], (1, 4 * H), jnp.float32, -k, k)  # b_ih+b_hh folded

    w1 = jax.random.uniform(ks[4], (H, D), jnp.float32, -k, k)
    b1 = jax.random.uniform(ks[5], (1, D), jnp.float32, -k, k)

    k2 = 1.0 / jnp.sqrt(D)
    w2 = jax.random.uniform(ks[6], (D, V), jnp.float32, -k2, k2)
    b2 = jax.random.uniform(ks[7], (1, V), jnp.float32, -k2, k2)

    params = dict(emb_table=emb_table, w_ih=w_ih, w_hh=w_hh, b_lstm=b_lstm,
                  w1=w1, b1=b1, w2=w2, b2=b2)
    params["packed"] = pack_params(params)
    return params


# ------------------------- pure-JAX reference (check) -------------------------
def net_forward_ref(x, params):
    emb = jnp.take(params["emb_table"], x, axis=0)
    norm = jnp.sqrt(jnp.sum(emb * emb, axis=-1, keepdims=True))
    emb = emb * jnp.where(norm > MAX_NORM, MAX_NORM / (norm + 1e-7), 1.0)
    h = jnp.zeros((B, H), jnp.float32)
    c = jnp.zeros((B, H), jnp.float32)
    for t in range(T):
        gates = emb[:, t] @ params["w_ih"] + h @ params["w_hh"] + params["b_lstm"]
        i = jax.nn.sigmoid(gates[:, 0 * H:1 * H])
        f = jax.nn.sigmoid(gates[:, 1 * H:2 * H])
        g = jnp.tanh(gates[:, 2 * H:3 * H])
        o = jax.nn.sigmoid(gates[:, 3 * H:4 * H])
        c = f * c + i * g
        h = o * jnp.tanh(c)
    lin = h @ params["w1"] + params["b1"]
    return lin @ params["w2"] + params["b2"], h, c


if __name__ == "__main__":
    key = jax.random.PRNGKey(0)
    kp, kx = jax.random.split(key)
    params = init_params(kp)

    x = jax.random.randint(kx, (BATCH, WINDOW_SIZE), 0, VOCAB_SIZE, dtype=jnp.int32)

    logits, h, c = net_forward(x, params)
    jax.block_until_ready((logits, h, c))

    # sanity check against a pure-JAX reference of the original (unfused) math
    ref_logits, ref_h, ref_c = net_forward_ref(x, params)
    assert logits.shape == (BATCH, VOCAB_SIZE)
    assert h.shape == (1, BATCH, HIDDEN_DIM) and c.shape == (1, BATCH, HIDDEN_DIM)
    assert jnp.allclose(logits, ref_logits, atol=1e-4)
    assert jnp.allclose(h[0], ref_h, atol=1e-4)
    assert jnp.allclose(c[0], ref_c, atol=1e-4)

    print("KERNEL_OK")
</pallas_src>

<mosaic_0001>
module attributes {stable_mosaic.version = 11 : i64} {
  func.func @net_kernel(%arg0: memref<32x1xi32, #tpu.memory_space<vmem>>, %arg1: memref<32x128xf32, #tpu.memory_space<vmem>>, %arg2: memref<4x16xf32, #tpu.memory_space<vmem>>, %arg3: memref<4x48xf32, #tpu.memory_space<vmem>>) attributes {dimension_semantics = [], scalar_prefetch = 0 : i64, scratch_operands = 0 : i64, tpu.core_type = #tpu.core_type<tc>} {
    %c0 = arith.constant 0 : index
    %c0_0 = arith.constant 0 : index
    %0 = vector.load %arg1[%c0, %c0_0] : memref<32x128xf32, #tpu.memory_space<vmem>>, vector<32x128xf32>
    %1 = vector.extract_strided_slice %0 {offsets = [0, 0], sizes = [32, 32], strides = [1, 1]} : vector<32x128xf32> to vector<32x32xf32>
    %2 = vector.extract_strided_slice %0 {offsets = [0, 32], sizes = [8, 32], strides = [1, 1]} : vector<32x128xf32> to vector<8x32xf32>
    %3 = vector.extract_strided_slice %0 {offsets = [0, 64], sizes = [8, 32], strides = [1, 1]} : vector<32x128xf32> to vector<8x32xf32>
    %4 = vector.extract_strided_slice %0 {offsets = [0, 96], sizes = [1, 32], strides = [1, 1]} : vector<32x128xf32> to vector<1x32xf32>
    %c0_1 = arith.constant 0 : index
    %c0_2 = arith.constant 0 : index
    %5 = vector.load %arg0[%c0_1, %c0_2] : memref<32x1xi32, #tpu.memory_space<vmem>>, vector<32x1xi32>
    %6 = tpu.iota {dimensions = array<i32: 1>} : vector<32x32xi32>
    %7 = vector.broadcast %5 : vector<32x1xi32> to vector<32x32xi32>
    %8 = arith.cmpi eq, %7, %6 : vector<32x32xi32>
    %9 = arith.extui %8 : vector<32x32xi1> to vector<32x32xi32>
    %10 = arith.sitofp %9 : vector<32x32xi32> to vector<32x32xf32>
    %cst = arith.constant dense<0.000000e+00> : vector<32x32xf32>
    %11 = tpu.matmul %10, %1, %cst {dimension_numbers = #tpu.dot_dimension_numbers<[1], [0], [0], [1], [0, 0, 1, 1], [], []>} : vector<32x32xf32>, vector<32x32xf32>, vector<32x32xf32> -> vector<32x32xf32>
    %c0_3 = arith.constant 0 : index
    %c0_4 = arith.constant 0 : index
    %12 = vector.load %arg2[%c0_3, %c0_4] : memref<4x16xf32, #tpu.memory_space<vmem>>, vector<4x8xf32>
    %c0_5 = arith.constant 0 : index
    %c8 = arith.constant 8 : index
    %13 = vector.load %arg2[%c0_5, %c8] : memref<4x16xf32, #tpu.memory_space<vmem>>, vector<4x8xf32>
    %14 = vector.extract_strided_slice %11 {offsets = [0, 0], sizes = [4, 32], strides = [1, 1]} : vector<32x32xf32> to vector<4x32xf32>
    %15 = vector.extract_strided_slice %12 {offsets = [0, 0], sizes = [4, 1], strides = [1, 1]} : vector<4x8xf32> to vector<4x1xf32>
    %16 = vector.extract_strided_slice %2 {offsets = [0, 0], sizes = [1, 32], strides = [1, 1]} : vector<8x32xf32> to vector<1x32xf32>
    %17 = vector.broadcast %15 : vector<4x1xf32> to vector<4x32xf32>
    %18 = vector.broadcast %16 : vector<1x32xf32> to vector<4x32xf32>
    %19 = arith.mulf %17, %18 : vector<4x32xf32>
    %20 = arith.addf %14, %19 : vector<4x32xf32>
    %21 = vector.extract_strided_slice %12 {offsets = [0, 1], sizes = [4, 1], strides = [1, 1]} : vector<4x8xf32> to vector<4x1xf32>
    %22 = vector.extract_strided_slice %2 {offsets = [1, 0], sizes = [1, 32], strides = [1, 1]} : vector<8x32xf32> to vector<1x32xf32>
    %23 = vector.broadcast %21 : vector<4x1xf32> to vector<4x32xf32>
    %24 = vector.broadcast %22 : vector<1x32xf32> to vector<4x32xf32>
    %25 = arith.mulf %23, %24 : vector<4x32xf32>
    %26 = arith.addf %20, %25 : vector<4x32xf32>
    %27 = vector.extract_strided_slice %12 {offsets = [0, 2], sizes = [4, 1], strides = [1, 1]} : vector<4x8xf32> to vector<4x1xf32>
    %28 = vector.extract_strided_slice %2 {offsets = [2, 0], sizes = [1, 32], strides = [1, 1]} : vector<8x32xf32> to vector<1x32xf32>
    %29 = vector.broadcast %27 : vector<4x1xf32> to vector<4x32xf32>
    %30 = vector.broadcast %28 : vector<1x32xf32> to vector<4x32xf32>
    %31 = arith.mulf %29, %30 : vector<4x32xf32>
    %32 = arith.addf %26, %31 : vector<4x32xf32>
    %33 = vector.extract_strided_slice %12 {offsets = [0, 3], sizes = [4, 1], strides = [1, 1]} : vector<4x8xf32> to vector<4x1xf32>
    %34 = vector.extract_strided_slice %2 {offsets = [3, 0], sizes = [1, 32], strides = [1, 1]} : vector<8x32xf32> to vector<1x32xf32>
    %35 = vector.broadcast %33 : vector<4x1xf32> to vector<4x32xf32>
    %36 = vector.broadcast %34 : vector<1x32xf32> to vector<4x32xf32>
    %37 = arith.mulf %35, %36 : vector<4x32xf32>
    %38 = arith.addf %32, %37 : vector<4x32xf32>
    %39 = vector.extract_strided_slice %12 {offsets = [0, 4], sizes = [4, 1], strides = [1, 1]} : vector<4x8xf32> to vector<4x1xf32>
    %40 = vector.extract_strided_slice %2 {offsets = [4, 0], sizes = [1, 32], strides = [1, 1]} : vector<8x32xf32> to vector<1x32xf32>
    %41 = vector.broadcast %39 : vector<4x1xf32> to vector<4x32xf32>
    %42 = vector.broadcast %40 : vector<1x32xf32> to vector<4x32xf32>
    %43 = arith.mulf %41, %42 : vector<4x32xf32>
    %44 = arith.addf %38, %43 : vector<4x32xf32>
    %45 = vector.extract_strided_slice %12 {offsets = [0, 5], sizes = [4, 1], strides = [1, 1]} : vector<4x8xf32> to vector<4x1xf32>
    %46 = vector.extract_strided_slice %2 {offsets = [5, 0], sizes = [1, 32], strides = [1, 1]} : vector<8x32xf32> to vector<1x32xf32>
    %47 = vector.broadcast %45 : vector<4x1xf32> to vector<4x32xf32>
    %48 = vector.broadcast %46 : vector<1x32xf32> to vector<4x32xf32>
    %49 = arith.mulf %47, %48 : vector<4x32xf32>
    %50 = arith.addf %44, %49 : vector<4x32xf32>
    %51 = vector.extract_strided_slice %12 {offsets = [0, 6], sizes = [4, 1], strides = [1, 1]} : vector<4x8xf32> to vector<4x1xf32>
    %52 = vector.extract_strided_slice %2 {offsets = [6, 0], sizes = [1, 32], strides = [1, 1]} : vector<8x32xf32> to vector<1x32xf32>
    %53 = vector.broadcast %51 : vector<4x1xf32> to vector<4x32xf32>
    %54 = vector.broadcast %52 : vector<1x32xf32> to vector<4x32xf32>
    %55 = arith.mulf %53, %54 : vector<4x32xf32>
    %56 = arith.addf %50, %55 : vector<4x32xf32>
    %57 = vector.extract_strided_slice %12 {offsets = [0, 7], sizes = [4, 1], strides = [1, 1]} : vector<4x8xf32> to vector<4x1xf32>
    %58 = vector.extract_strided_slice %2 {offsets = [7, 0], sizes = [1, 32], strides = [1, 1]} : vector<8x32xf32> to vector<1x32xf32>
    %59 = vector.broadcast %57 : vector<4x1xf32> to vector<4x32xf32>
    %60 = vector.broadcast %58 : vector<1x32xf32> to vector<4x32xf32>
    %61 = arith.mulf %59, %60 : vector<4x32xf32>
    %62 = arith.addf %56, %61 : vector<4x32xf32>
    %63 = arith.negf %62 : vector<4x32xf32>
    %64 = math.exp %63 : vector<4x32xf32>
    %cst_6 = arith.constant 1.000000e+00 : f32
    %65 = vector.broadcast %cst_6 : f32 to vector<4x32xf32>
    %66 = arith.addf %65, %64 : vector<4x32xf32>
    %67 = arith.divf %65, %66 : vector<4x32xf32>
    %68 = vector.extract_strided_slice %67 {offsets = [0, 0], sizes = [4, 8], strides = [1, 1]} : vector<4x32xf32> to vector<4x8xf32>
    %69 = vector.extract_strided_slice %67 {offsets = [0, 8], sizes = [4, 8], strides = [1, 1]} : vector<4x32xf32> to vector<4x8xf32>
    %70 = vector.extract_strided_slice %67 {offsets = [0, 16], sizes = [4, 8], strides = [1, 1]} : vector<4x32xf32> to vector<4x8xf32>
    %cst_7 = arith.constant 2.000000e+00 : f32
    %71 = vector.broadcast %cst_7 : f32 to vector<4x8xf32>
    %72 = arith.mulf %71, %70 : vector<4x8xf32>
    %cst_8 = arith.constant 1.000000e+00 : f32
    %73 = vector.broadcast %cst_8 : f32 to vector<4x8xf32>
    %74 = arith.subf %72, %73 : vector<4x8xf32>
    %75 = vector.extract_strided_slice %67 {offsets = [0, 24], sizes = [4, 8], strides = [1, 1]} : vector<4x32xf32> to vector<4x8xf32>
    %76 = arith.mulf %69, %13 : vector<4x8xf32>
    %77 = arith.mulf %68, %74 : vector<4x8xf32>
    %78 = arith.addf %76, %77 : vector<4x8xf32>
    %79 = math.tanh %78 : vector<4x8xf32>
    %80 = arith.mulf %75, %79 : vector<4x8xf32>
    %81 = vector.extract_strided_slice %11 {offsets = [4, 0], sizes = [4, 32], strides = [1, 1]} : vector<32x32xf32> to vector<4x32xf32>
    %82 = vector.extract_strided_slice %80 {offsets = [0, 0], sizes = [4, 1], strides = [1, 1]} : vector<4x8xf32> to vector<4x1xf32>
    %83 = vector.extract_strided_slice %2 {offsets = [0, 0], sizes = [1, 32], strides = [1, 1]} : vector<8x32xf32> to vector<1x32xf32>
    %84 = vector.broadcast %82 : vector<4x1xf32> to vector<4x32xf32>
    %85 = vector.broadcast %83 : vector<1x32xf32> to vector<4x32xf32>
    %86 = arith.mulf %84, %85 : vector<4x32xf32>
    %87 = arith.addf %81, %86 : vector<4x32xf32>
    %88 = vector.extract_strided_slice %80 {offsets = [0, 1], sizes = [4, 1], strides = [1, 1]} : vector<4x8xf32> to vector<4x1xf32>
    %89 = vector.extract_strided_slice %2 {offsets = [1, 0], sizes = [1, 32], strides = [1, 1]} : vector<8x32xf32> to vector<1x32xf32>
    %90 = vector.broadcast %88 : vector<4x1xf32> to vector<4x32xf32>
    %91 = vector.broadcast %89 : vector<1x32xf32> to vector<4x32xf32>
    %92 = arith.mulf %90, %91 : vector<4x32xf32>
    %93 = arith.addf %87, %92 : vector<4x32xf32>
    %94 = vector.extract_strided_slice %80 {offsets = [0, 2], sizes = [4, 1], strides = [1, 1]} : vector<4x8xf32> to vector<4x1xf32>
    %95 = vector.extract_strided_slice %2 {offsets = [2, 0], sizes = [1, 32], strides = [1, 1]} : vector<8x32xf32> to vector<1x32xf32>
    %96 = vector.broadcast %94 : vector<4x1xf32> to vector<4x32xf32>
    %97 = vector.broadcast %95 : vector<1x32xf32> to vector<4x32xf32>
    %98 = arith.mulf %96, %97 : vector<4x32xf32>
    %99 = arith.addf %93, %98 : vector<4x32xf32>
    %100 = vector.extract_strided_slice %80 {offsets = [0, 3], sizes = [4, 1], strides = [1, 1]} : vector<4x8xf32> to vector<4x1xf32>
    %101 = vector.extract_strided_slice %2 {offsets = [3, 0], sizes = [1, 32], strides = [1, 1]} : vector<8x32xf32> to vector<1x32xf32>
    %102 = vector.broadcast %100 : vector<4x1xf32> to vector<4x32xf32>
    %103 = vector.broadcast %101 : vector<1x32xf32> to vector<4x32xf32>
    %104 = arith.mulf %102, %103 : vector<4x32xf32>
    %105 = arith.addf %99, %104 : vector<4x32xf32>
    %106 = vector.extract_strided_slice %80 {offsets = [0, 4], sizes = [4, 1], strides = [1, 1]} : vector<4x8xf32> to vector<4x1xf32>
    %107 = vector.extract_strided_slice %2 {offsets = [4, 0], sizes = [1, 32], strides = [1, 1]} : vector<8x32xf32> to vector<1x32xf32>
    %108 = vector.broadcast %106 : vector<4x1xf32> to vector<4x32xf32>
    %109 = vector.broadcast %107 : vector<1x32xf32> to vector<4x32xf32>
    %110 = arith.mulf %108, %109 : vector<4x32xf32>
    %111 = arith.addf %105, %110 : vector<4x32xf32>
    %112 = vector.extract_strided_slice %80 {offsets = [0, 5], sizes = [4, 1], strides = [1, 1]} : vector<4x8xf32> to vector<4x1xf32>
    %113 = vector.extract_strided_slice %2 {offsets = [5, 0], sizes = [1, 32], strides = [1, 1]} : vector<8x32xf32> to vector<1x32xf32>
    %114 = vector.broadcast %112 : vector<4x1xf32> to vector<4x32xf32>
    %115 = vector.broadcast %113 : vector<1x32xf32> to vector<4x32xf32>
    %116 = arith.mulf %114, %115 : vector<4x32xf32>
    %117 = arith.addf %111, %116 : vector<4x32xf32>
    %118 = vector.extract_strided_slice %80 {offsets = [0, 6], sizes = [4, 1], strides = [1, 1]} : vector<4x8xf32> to vector<4x1xf32>
    %119 = vector.extract_strided_slice %2 {offsets = [6, 0], sizes = [1, 32], strides = [1, 1]} : vector<8x32xf32> to vector<1x32xf32>
    %120 = vector.broadcast %118 : vector<4x1xf32> to vector<4x32xf32>
    %121 = vector.broadcast %119 : vector<1x32xf32> to vector<4x32xf32>
    %122 = arith.mulf %120, %121 : vector<4x32xf32>
    %123 = arith.addf %117, %122 : vector<4x32xf32>
    %124 = vector.extract_strided_slice %80 {offsets = [0, 7], sizes = [4, 1], strides = [1, 1]} : vector<4x8xf32> to vector<4x1xf32>
    %125 = vector.extract_strided_slice %2 {offsets = [7, 0], sizes = [1, 32], strides = [1, 1]} : vector<8x32xf32> to vector<1x32xf32>
    %126 = vector.broadcast %124 : vector<4x1xf32> to vector<4x32xf32>
    %127 = vector.broadcast %125 : vector<1x32xf32> to vector<4x32xf32>
    %128 = arith.mulf %126, %127 : vector<4x32xf32>
    %129 = arith.addf %123, %128 : vector<4x32xf32>
    %130 = arith.negf %129 : vector<4x32xf32>
    %131 = math.exp %130 : vector<4x32xf32>
    %cst_9 = arith.constant 1.000000e+00 : f32
    %132 = vector.broadcast %cst_9 : f32 to vector<4x32xf32>
    %133 = arith.addf %132, %131 : vector<4x32xf32>
    %134 = arith.divf %132, %133 : vector<4x32xf32>
    %135 = vector.extract_strided_slice %134 {offsets = [0, 0], sizes = [4, 8], strides = [1, 1]} : vector<4x32xf32> to vector<4x8xf32>
    %136 = vector.extract_strided_slice %134 {offsets = [0, 8], sizes = [4, 8], strides = [1, 1]} : vector<4x32xf32> to vector<4x8xf32>
    %137 = vector.extract_strided_slice %134 {offsets = [0, 16], sizes = [4, 8], strides = [1, 1]} : vector<4x32xf32> to vector<4x8xf32>
    %cst_10 = arith.constant 2.000000e+00 : f32
    %138 = vector.broadcast %cst_10 : f32 to vector<4x8xf32>
    %139 = arith.mulf %138, %137 : vector<4x8xf32>
    %cst_11 = arith.constant 1.000000e+00 : f32
    %140 = vector.broadcast %cst_11 : f32 to vector<4x8xf32>
    %141 = arith.subf %139, %140 : vector<4x8xf32>
    %142 = vector.extract_strided_slice %134 {offsets = [0, 24], sizes = [4, 8], strides = [1, 1]} : vector<4x32xf32> to vector<4x8xf32>
    %143 = arith.mulf %136, %78 : vector<4x8xf32>
    %144 = arith.mulf %135, %141 : vector<4x8xf32>
    %145 = arith.addf %143, %144 : vector<4x8xf32>
    %146 = math.tanh %145 : vector<4x8xf32>
    %147 = arith.mulf %142, %146 : vector<4x8xf32>
    %148 = vector.extract_strided_slice %11 {offsets = [8, 0], sizes = [4, 32], strides = [1, 1]} : vector<32x32xf32> to vector<4x32xf32>
    %149 = vector.extract_strided_slice %147 {offsets = [0, 0], sizes = [4, 1], strides = [1, 1]} : vector<4x8xf32> to vector<4x1xf32>
    %150 = vector.extract_strided_slice %2 {offsets = [0, 0], sizes = [1, 32], strides = [1, 1]} : vector<8x32xf32> to vector<1x32xf32>
    %151 = vector.broadcast %149 : vector<4x1xf32> to vector<4x32xf32>
    %152 = vector.broadcast %150 : vector<1x32xf32> to vector<4x32xf32>
    %153 = arith.mulf %151, %152 : vector<4x32xf32>
    %154 = arith.addf %148, %153 : vector<4x32xf32>
    %155 = vector.extract_strided_slice %147 {offsets = [0, 1], sizes = [4, 1], strides = [1, 1]} : vector<4x8xf32> to vector<4x1xf32>
    %156 = vector.extract_strided_slice %2 {offsets = [1, 0], sizes = [1, 32], strides = [1, 1]} : vector<8x32xf32> to vector<1x32xf32>
    %157 = vector.broadcast %155 : vector<4x1xf32> to vector<4x32xf32>
    %158 = vector.broadcast %156 : vector<1x32xf32> to vector<4x32xf32>
    %159 = arith.mulf %157, %158 : vector<4x32xf32>
    %160 = arith.addf %154, %159 : vector<4x32xf32>
    %161 = vector.extract_strided_slice %147 {offsets = [0, 2], sizes = [4, 1], strides = [1, 1]} : vector<4x8xf32> to vector<4x1xf32>
    %162 = vector.extract_strided_slice %2 {offsets = [2, 0], sizes = [1, 32], strides = [1, 1]} : vector<8x32xf32> to vector<1x32xf32>
    %163 = vector.broadcast %161 : vector<4x1xf32> to vector<4x32xf32>
    %164 = vector.broadcast %162 : vector<1x32xf32> to vector<4x32xf32>
    %165 = arith.mulf %163, %164 : vector<4x32xf32>
    %166 = arith.addf %160, %165 : vector<4x32xf32>
    %167 = vector.extract_strided_slice %147 {offsets = [0, 3], sizes = [4, 1], strides = [1, 1]} : vector<4x8xf32> to vector<4x1xf32>
    %168 = vector.extract_strided_slice %2 {offsets = [3, 0], sizes = [1, 32], strides = [1, 1]} : vector<8x32xf32> to vector<1x32xf32>
    %169 = vector.broadcast %167 : vector<4x1xf32> to vector<4x32xf32>
    %170 = vector.broadcast %168 : vector<1x32xf32> to vector<4x32xf32>
    %171 = arith.mulf %169, %170 : vector<4x32xf32>
    %172 = arith.addf %166, %171 : vector<4x32xf32>
    %173 = vector.extract_strided_slice %147 {offsets = [0, 4], sizes = [4, 1], strides = [1, 1]} : vector<4x8xf32> to vector<4x1xf32>
    %174 = vector.extract_strided_slice %2 {offsets = [4, 0], sizes = [1, 32], strides = [1, 1]} : vector<8x32xf32> to vector<1x32xf32>
    %175 = vector.broadcast %173 : vector<4x1xf32> to vector<4x32xf32>
    %176 = vector.broadcast %174 : vector<1x32xf32> to vector<4x32xf32>
    %177 = arith.mulf %175, %176 : vector<4x32xf32>
    %178 = arith.addf %172, %177 : vector<4x32xf32>
    %179 = vector.extract_strided_slice %147 {offsets = [0, 5], sizes = [4, 1], strides = [1, 1]} : vector<4x8xf32> to vector<4x1xf32>
    %180 = vector.extract_strided_slice %2 {offsets = [5, 0], sizes = [1, 32], strides = [1, 1]} : vector<8x32xf32> to vector<1x32xf32>
    %181 = vector.broadcast %179 : vector<4x1xf32> to vector<4x32xf32>
    %182 = vector.broadcast %180 : vector<1x32xf32> to vector<4x32xf32>
    %183 = arith.mulf %181, %182 : vector<4x32xf32>
    %184 = arith.addf %178, %183 : vector<4x32xf32>
    %185 = vector.extract_strided_slice %147 {offsets = [0, 6], sizes = [4, 1], strides = [1, 1]} : vector<4x8xf32> to vector<4x1xf32>
    %186 = vector.extract_strided_slice %2 {offsets = [6, 0], sizes = [1, 32], strides = [1, 1]} : vector<8x32xf32> to vector<1x32xf32>
    %187 = vector.broadcast %185 : vector<4x1xf32> to vector<4x32xf32>
    %188 = vector.broadcast %186 : vector<1x32xf32> to vector<4x32xf32>
    %189 = arith.mulf %187, %188 : vector<4x32xf32>
    %190 = arith.addf %184, %189 : vector<4x32xf32>
    %191 = vector.extract_strided_slice %147 {offsets = [0, 7], sizes = [4, 1], strides = [1, 1]} : vector<4x8xf32> to vector<4x1xf32>
    %192 = vector.extract_strided_slice %2 {offsets = [7, 0], sizes = [1, 32], strides = [1, 1]} : vector<8x32xf32> to vector<1x32xf32>
    %193 = vector.broadcast %191 : vector<4x1xf32> to vector<4x32xf32>
    %194 = vector.broadcast %192 : vector<1x32xf32> to vector<4x32xf32>
    %195 = arith.mulf %193, %194 : vector<4x32xf32>
    %196 = arith.addf %190, %195 : vector<4x32xf32>
    %197 = arith.negf %196 : vector<4x32xf32>
    %198 = math.exp %197 : vector<4x32xf32>
    %cst_12 = arith.constant 1.000000e+00 : f32
    %199 = vector.broadcast %cst_12 : f32 to vector<4x32xf32>
    %200 = arith.addf %199, %198 : vector<4x32xf32>
    %201 = arith.divf %199, %200 : vector<4x32xf32>
    %202 = vector.extract_strided_slice %201 {offsets = [0, 0], sizes = [4, 8], strides = [1, 1]} : vector<4x32xf32> to vector<4x8xf32>
    %203 = vector.extract_strided_slice %201 {offsets = [0, 8], sizes = [4, 8], strides = [1, 1]} : vector<4x32xf32> to vector<4x8xf32>
    %204 = vector.extract_strided_slice %201 {offsets = [0, 16], sizes = [4, 8], strides = [1, 1]} : vector<4x32xf32> to vector<4x8xf32>
    %cst_13 = arith.constant 2.000000e+00 : f32
    %205 = vector.broadcast %cst_13 : f32 to vector<4x8xf32>
    %206 = arith.mulf %205, %204 : vector<4x8xf32>
    %cst_14 = arith.constant 1.000000e+00 : f32
    %207 = vector.broadcast %cst_14 : f32 to vector<4x8xf32>
    %208 = arith.subf %206, %207 : vector<4x8xf32>
    %209 = vector.extract_strided_slice %201 {offsets = [0, 24], sizes = [4, 8], strides = [1, 1]} : vector<4x32xf32> to vector<4x8xf32>
    %210 = arith.mulf %203, %145 : vector<4x8xf32>
    %211 = arith.mulf %202, %208 : vector<4x8xf32>
    %212 = arith.addf %210, %211 : vector<4x8xf32>
    %213 = math.tanh %212 : vector<4x8xf32>
    %214 = arith.mulf %209, %213 : vector<4x8xf32>
    %215 = vector.extract_strided_slice %11 {offsets = [12, 0], sizes = [4, 32], strides = [1, 1]} : vector<32x32xf32> to vector<4x32xf32>
    %216 = vector.extract_strided_slice %214 {offsets = [0, 0], sizes = [4, 1], strides = [1, 1]} : vector<4x8xf32> to vector<4x1xf32>
    %217 = vector.extract_strided_slice %2 {offsets = [0, 0], sizes = [1, 32], strides = [1, 1]} : vector<8x32xf32> to vector<1x32xf32>
    %218 = vector.broadcast %216 : vector<4x1xf32> to vector<4x32xf32>
    %219 = vector.broadcast %217 : vector<1x32xf32> to vector<4x32xf32>
    %220 = arith.mulf %218, %219 : vector<4x32xf32>
    %221 = arith.addf %215, %220 : vector<4x32xf32>
    %222 = vector.extract_strided_slice %214 {offsets = [0, 1], sizes = [4, 1], strides = [1, 1]} : vector<4x8xf32> to vector<4x1xf32>
    %223 = vector.extract_strided_slice %2 {offsets = [1, 0], sizes = [1, 32], strides = [1, 1]} : vector<8x32xf32> to vector<1x32xf32>
    %224 = vector.broadcast %222 : vector<4x1xf32> to vector<4x32xf32>
    %225 = vector.broadcast %223 : vector<1x32xf32> to vector<4x32xf32>
    %226 = arith.mulf %224, %225 : vector<4x32xf32>
    %227 = arith.addf %221, %226 : vector<4x32xf32>
    %228 = vector.extract_strided_slice %214 {offsets = [0, 2], sizes = [4, 1], strides = [1, 1]} : vector<4x8xf32> to vector<4x1xf32>
    %229 = vector.extract_strided_slice %2 {offsets = [2, 0], sizes = [1, 32], strides = [1, 1]} : vector<8x32xf32> to vector<1x32xf32>
    %230 = vector.broadcast %228 : vector<4x1xf32> to vector<4x32xf32>
    %231 = vector.broadcast %229 : vector<1x32xf32> to vector<4x32xf32>
    %232 = arith.mulf %230, %231 : vector<4x32xf32>
    %233 = arith.addf %227, %232 : vector<4x32xf32>
    %234 = vector.extract_strided_slice %214 {offsets = [0, 3], sizes = [4, 1], strides = [1, 1]} : vector<4x8xf32> to vector<4x1xf32>
    %235 = vector.extract_strided_slice %2 {offsets = [3, 0], sizes = [1, 32], strides = [1, 1]} : vector<8x32xf32> to vector<1x32xf32>
    %236 = vector.broadcast %234 : vector<4x1xf32> to vector<4x32xf32>
    %237 = vector.broadcast %235 : vector<1x32xf32> to vector<4x32xf32>
    %238 = arith.mulf %236, %237 : vector<4x32xf32>
    %239 = arith.addf %233, %238 : vector<4x32xf32>
    %240 = vector.extract_strided_slice %214 {offsets = [0, 4], sizes = [4, 1], strides = [1, 1]} : vector<4x8xf32> to vector<4x1xf32>
    %241 = vector.extract_strided_slice %2 {offsets = [4, 0], sizes = [1, 32], strides = [1, 1]} : vector<8x32xf32> to vector<1x32xf32>
    %242 = vector.broadcast %240 : vector<4x1xf32> to vector<4x32xf32>
    %243 = vector.broadcast %241 : vector<1x32xf32> to vector<4x32xf32>
    %244 = arith.mulf %242, %243 : vector<4x32xf32>
    %245 = arith.addf %239, %244 : vector<4x32xf32>
    %246 = vector.extract_strided_slice %214 {offsets = [0, 5], sizes = [4, 1], strides = [1, 1]} : vector<4x8xf32> to vector<4x1xf32>
    %247 = vector.extract_strided_slice %2 {offsets = [5, 0], sizes = [1, 32], strides = [1, 1]} : vector<8x32xf32> to vector<1x32xf32>
    %248 = vector.broadcast %246 : vector<4x1xf32> to vector<4x32xf32>
    %249 = vector.broadcast %247 : vector<1x32xf32> to vector<4x32xf32>
    %250 = arith.mulf %248, %249 : vector<4x32xf32>
    %251 = arith.addf %245, %250 : vector<4x32xf32>
    %252 = vector.extract_strided_slice %214 {offsets = [0, 6], sizes = [4, 1], strides = [1, 1]} : vector<4x8xf32> to vector<4x1xf32>
    %253 = vector.extract_strided_slice %2 {offsets = [6, 0], sizes = [1, 32], strides = [1, 1]} : vector<8x32xf32> to vector<1x32xf32>
    %254 = vector.broadcast %252 : vector<4x1xf32> to vector<4x32xf32>
    %255 = vector.broadcast %253 : vector<1x32xf32> to vector<4x32xf32>
    %256 = arith.mulf %254, %255 : vector<4x32xf32>
    %257 = arith.addf %251, %256 : vector<4x32xf32>
    %258 = vector.extract_strided_slice %214 {offsets = [0, 7], sizes = [4, 1], strides = [1, 1]} : vector<4x8xf32> to vector<4x1xf32>
    %259 = vector.extract_strided_slice %2 {offsets = [7, 0], sizes = [1, 32], strides = [1, 1]} : vector<8x32xf32> to vector<1x32xf32>
    %260 = vector.broadcast %258 : vector<4x1xf32> to vector<4x32xf32>
    %261 = vector.broadcast %259 : vector<1x32xf32> to vector<4x32xf32>
    %262 = arith.mulf %260, %261 : vector<4x32xf32>
    %263 = arith.addf %257, %262 : vector<4x32xf32>
    %264 = arith.negf %263 : vector<4x32xf32>
    %265 = math.exp %264 : vector<4x32xf32>
    %cst_15 = arith.constant 1.000000e+00 : f32
    %266 = vector.broadcast %cst_15 : f32 to vector<4x32xf32>
    %267 = arith.addf %266, %265 : vector<4x32xf32>
    %268 = arith.divf %266, %267 : vector<4x32xf32>
    %269 = vector.extract_strided_slice %268 {offsets = [0, 0], sizes = [4, 8], strides = [1, 1]} : vector<4x32xf32> to vector<4x8xf32>
    %270 = vector.extract_strided_slice %268 {offsets = [0, 8], sizes = [4, 8], strides = [1, 1]} : vector<4x32xf32> to vector<4x8xf32>
    %271 = vector.extract_strided_slice %268 {offsets = [0, 16], sizes = [4, 8], strides = [1, 1]} : vector<4x32xf32> to vector<4x8xf32>
    %cst_16 = arith.constant 2.000000e+00 : f32
    %272 = vector.broadcast %cst_16 : f32 to vector<4x8xf32>
    %273 = arith.mulf %272, %271 : vector<4x8xf32>
    %cst_17 = arith.constant 1.000000e+00 : f32
    %274 = vector.broadcast %cst_17 : f32 to vector<4x8xf32>
    %275 = arith.subf %273, %274 : vector<4x8xf32>
    %276 = vector.extract_strided_slice %268 {offsets = [0, 24], sizes = [4, 8], strides = [1, 1]} : vector<4x32xf32> to vector<4x8xf32>
    %277 = arith.mulf %270, %212 : vector<4x8xf32>
    %278 = arith.mulf %269, %275 : vector<4x8xf32>
    %279 = arith.addf %277, %278 : vector<4x8xf32>
    %280 = math.tanh %279 : vector<4x8xf32>
    %281 = arith.mulf %276, %280 : vector<4x8xf32>
    %282 = vector.extract_strided_slice %11 {offsets = [16, 0], sizes = [4, 32], strides = [1, 1]} : vector<32x32xf32> to vector<4x32xf32>
    %283 = vector.extract_strided_slice %281 {offsets = [0, 0], sizes = [4, 1], strides = [1, 1]} : vector<4x8xf32> to vector<4x1xf32>
    %284 = vector.extract_strided_slice %2 {offsets = [0, 0], sizes = [1, 32], strides = [1, 1]} : vector<8x32xf32> to vector<1x32xf32>
    %285 = vector.broadcast %283 : vector<4x1xf32> to vector<4x32xf32>
    %286 = vector.broadcast %284 : vector<1x32xf32> to vector<4x32xf32>
    %287 = arith.mulf %285, %286 : vector<4x32xf32>
    %288 = arith.addf %282, %287 : vector<4x32xf32>
    %289 = vector.extract_strided_slice %281 {offsets = [0, 1], sizes = [4, 1], strides = [1, 1]} : vector<4x8xf32> to vector<4x1xf32>
    %290 = vector.extract_strided_slice %2 {offsets = [1, 0], sizes = [1, 32], strides = [1, 1]} : vector<8x32xf32> to vector<1x32xf32>
    %291 = vector.broadcast %289 : vector<4x1xf32> to vector<4x32xf32>
    %292 = vector.broadcast %290 : vector<1x32xf32> to vector<4x32xf32>
    %293 = arith.mulf %291, %292 : vector<4x32xf32>
    %294 = arith.addf %288, %293 : vector<4x32xf32>
    %295 = vector.extract_strided_slice %281 {offsets = [0, 2], sizes = [4, 1], strides = [1, 1]} : vector<4x8xf32> to vector<4x1xf32>
    %296 = vector.extract_strided_slice %2 {offsets = [2, 0], sizes = [1, 32], strides = [1, 1]} : vector<8x32xf32> to vector<1x32xf32>
    %297 = vector.broadcast %295 : vector<4x1xf32> to vector<4x32xf32>
    %298 = vector.broadcast %296 : vector<1x32xf32> to vector<4x32xf32>
    %299 = arith.mulf %297, %298 : vector<4x32xf32>
    %300 = arith.addf %294, %299 : vector<4x32xf32>
    %301 = vector.extract_strided_slice %281 {offsets = [0, 3], sizes = [4, 1], strides = [1, 1]} : vector<4x8xf32> to vector<4x1xf32>
    %302 = vector.extract_strided_slice %2 {offsets = [3, 0], sizes = [1, 32], strides = [1, 1]} : vector<8x32xf32> to vector<1x32xf32>
    %303 = vector.broadcast %301 : vector<4x1xf32> to vector<4x32xf32>
    %304 = vector.broadcast %302 : vector<1x32xf32> to vector<4x32xf32>
    %305 = arith.mulf %303, %304 : vector<4x32xf32>
    %306 = arith.addf %300, %305 : vector<4x32xf32>
    %307 = vector.extract_strided_slice %281 {offsets = [0, 4], sizes = [4, 1], strides = [1, 1]} : vector<4x8xf32> to vector<4x1xf32>
    %308 = vector.extract_strided_slice %2 {offsets = [4, 0], sizes = [1, 32], strides = [1, 1]} : vector<8x32xf32> to vector<1x32xf32>
    %309 = vector.broadcast %307 : vector<4x1xf32> to vector<4x32xf32>
    %310 = vector.broadcast %308 : vector<1x32xf32> to vector<4x32xf32>
    %311 = arith.mulf %309, %310 : vector<4x32xf32>
    %312 = arith.addf %306, %311 : vector<4x32xf32>
    %313 = vector.extract_strided_slice %281 {offsets = [0, 5], sizes = [4, 1], strides = [1, 1]} : vector<4x8xf32> to vector<4x1xf32>
    %314 = vector.extract_strided_slice %2 {offsets = [5, 0], sizes = [1, 32], strides = [1, 1]} : vector<8x32xf32> to vector<1x32xf32>
    %315 = vector.broadcast %313 : vector<4x1xf32> to vector<4x32xf32>
    %316 = vector.broadcast %314 : vector<1x32xf32> to vector<4x32xf32>
    %317 = arith.mulf %315, %316 : vector<4x32xf32>
    %318 = arith.addf %312, %317 : vector<4x32xf32>
    %319 = vector.extract_strided_slice %281 {offsets = [0, 6], sizes = [4, 1], strides = [1, 1]} : vector<4x8xf32> to vector<4x1xf32>
    %320 = vector.extract_strided_slice %2 {offsets = [6, 0], sizes = [1, 32], strides = [1, 1]} : vector<8x32xf32> to vector<1x32xf32>
    %321 = vector.broadcast %319 : vector<4x1xf32> to vector<4x32xf32>
    %322 = vector.broadcast %320 : vector<1x32xf32> to vector<4x32xf32>
    %323 = arith.mulf %321, %322 : vector<4x32xf32>
    %324 = arith.addf %318, %323 : vector<4x32xf32>
    %325 = vector.extract_strided_slice %281 {offsets = [0, 7], sizes = [4, 1], strides = [1, 1]} : vector<4x8xf32> to vector<4x1xf32>
    %326 = vector.extract_strided_slice %2 {offsets = [7, 0], sizes = [1, 32], strides = [1, 1]} : vector<8x32xf32> to vector<1x32xf32>
    %327 = vector.broadcast %325 : vector<4x1xf32> to vector<4x32xf32>
    %328 = vector.broadcast %326 : vector<1x32xf32> to vector<4x32xf32>
    %329 = arith.mulf %327, %328 : vector<4x32xf32>
    %330 = arith.addf %324, %329 : vector<4x32xf32>
    %331 = arith.negf %330 : vector<4x32xf32>
    %332 = math.exp %331 : vector<4x32xf32>
    %cst_18 = arith.constant 1.000000e+00 : f32
    %333 = vector.broadcast %cst_18 : f32 to vector<4x32xf32>
    %334 = arith.addf %333, %332 : vector<4x32xf32>
    %335 = arith.divf %333, %334 : vector<4x32xf32>
    %336 = vector.extract_strided_slice %335 {offsets = [0, 0], sizes = [4, 8], strides = [1, 1]} : vector<4x32xf32> to vector<4x8xf32>
    %337 = vector.extract_strided_slice %335 {offsets = [0, 8], sizes = [4, 8], strides = [1, 1]} : vector<4x32xf32> to vector<4x8xf32>
    %338 = vector.extract_strided_slice %335 {offsets = [0, 16], sizes = [4, 8], strides = [1, 1]} : vector<4x32xf32> to vector<4x8xf32>
    %cst_19 = arith.constant 2.000000e+00 : f32
    %339 = vector.broadcast %cst_19 : f32 to vector<4x8xf32>
    %340 = arith.mulf %339, %338 : vector<4x8xf32>
    %cst_20 = arith.constant 1.000000e+00 : f32
    %341 = vector.broadcast %cst_20 : f32 to vector<4x8xf32>
    %342 = arith.subf %340, %341 : vector<4x8xf32>
    %343 = vector.extract_strided_slice %335 {offsets = [0, 24], sizes = [4, 8], strides = [1, 1]} : vector<4x32xf32> to vector<4x8xf32>
    %344 = arith.mulf %337, %279 : vector<4x8xf32>
    %345 = arith.mulf %336, %342 : vector<4x8xf32>
    %346 = arith.addf %344, %345 : vector<4x8xf32>
    %347 = math.tanh %346 : vector<4x8xf32>
    %348 = arith.mulf %343, %347 : vector<4x8xf32>
    %349 = vector.extract_strided_slice %11 {offsets = [20, 0], sizes = [4, 32], strides = [1, 1]} : vector<32x32xf32> to vector<4x32xf32>
    %350 = vector.extract_strided_slice %348 {offsets = [0, 0], sizes = [4, 1], strides = [1, 1]} : vector<4x8xf32> to vector<4x1xf32>
    %351 = vector.extract_strided_slice %2 {offsets = [0, 0], sizes = [1, 32], strides = [1, 1]} : vector<8x32xf32> to vector<1x32xf32>
    %352 = vector.broadcast %350 : vector<4x1xf32> to vector<4x32xf32>
    %353 = vector.broadcast %351 : vector<1x32xf32> to vector<4x32xf32>
    %354 = arith.mulf %352, %353 : vector<4x32xf32>
    %355 = arith.addf %349, %354 : vector<4x32xf32>
    %356 = vector.extract_strided_slice %348 {offsets = [0, 1], sizes = [4, 1], strides = [1, 1]} : vector<4x8xf32> to vector<4x1xf32>
    %357 = vector.extract_strided_slice %2 {offsets = [1, 0], sizes = [1, 32], strides = [1, 1]} : vector<8x32xf32> to vector<1x32xf32>
    %358 = vector.broadcast %356 : vector<4x1xf32> to vector<4x32xf32>
    %359 = vector.broadcast %357 : vector<1x32xf32> to vector<4x32xf32>
    %360 = arith.mulf %358, %359 : vector<4x32xf32>
    %361 = arith.addf %355, %360 : vector<4x32xf32>
    %362 = vector.extract_strided_slice %348 {offsets = [0, 2], sizes = [4, 1], strides = [1, 1]} : vector<4x8xf32> to vector<4x1xf32>
    %363 = vector.extract_strided_slice %2 {offsets = [2, 0], sizes = [1, 32], strides = [1, 1]} : vector<8x32xf32> to vector<1x32xf32>
    %364 = vector.broadcast %362 : vector<4x1xf32> to vector<4x32xf32>
    %365 = vector.broadcast %363 : vector<1x32xf32> to vector<4x32xf32>
    %366 = arith.mulf %364, %365 : vector<4x32xf32>
    %367 = arith.addf %361, %366 : vector<4x32xf32>
    %368 = vector.extract_strided_slice %348 {offsets = [0, 3], sizes = [4, 1], strides = [1, 1]} : vector<4x8xf32> to vector<4x1xf32>
    %369 = vector.extract_strided_slice %2 {offsets = [3, 0], sizes = [1, 32], strides = [1, 1]} : vector<8x32xf32> to vector<1x32xf32>
    %370 = vector.broadcast %368 : vector<4x1xf32> to vector<4x32xf32>
    %371 = vector.broadcast %369 : vector<1x32xf32> to vector<4x32xf32>
    %372 = arith.mulf %370, %371 : vector<4x32xf32>
    %373 = arith.addf %367, %372 : vector<4x32xf32>
    %374 = vector.extract_strided_slice %348 {offsets = [0, 4], sizes = [4, 1], strides = [1, 1]} : vector<4x8xf32> to vector<4x1xf32>
    %375 = vector.extract_strided_slice %2 {offsets = [4, 0], sizes = [1, 32], strides = [1, 1]} : vector<8x32xf32> to vector<1x32xf32>
    %376 = vector.broadcast %374 : vector<4x1xf32> to vector<4x32xf32>
    %377 = vector.broadcast %375 : vector<1x32xf32> to vector<4x32xf32>
    %378 = arith.mulf %376, %377 : vector<4x32xf32>
    %379 = arith.addf %373, %378 : vector<4x32xf32>
    %380 = vector.extract_strided_slice %348 {offsets = [0, 5], sizes = [4, 1], strides = [1, 1]} : vector<4x8xf32> to vector<4x1xf32>
    %381 = vector.extract_strided_slice %2 {offsets = [5, 0], sizes = [1, 32], strides = [1, 1]} : vector<8x32xf32> to vector<1x32xf32>
    %382 = vector.broadcast %380 : vector<4x1xf32> to vector<4x32xf32>
    %383 = vector.broadcast %381 : vector<1x32xf32> to vector<4x32xf32>
    %384 = arith.mulf %382, %383 : vector<4x32xf32>
    %385 = arith.addf %379, %384 : vector<4x32xf32>
    %386 = vector.extract_strided_slice %348 {offsets = [0, 6], sizes = [4, 1], strides = [1, 1]} : vector<4x8xf32> to vector<4x1xf32>
    %387 = vector.extract_strided_slice %2 {offsets = [6, 0], sizes = [1, 32], strides = [1, 1]} : vector<8x32xf32> to vector<1x32xf32>
    %388 = vector.broadcast %386 : vector<4x1xf32> to vector<4x32xf32>
    %389 = vector.broadcast %387 : vector<1x32xf32> to vector<4x32xf32>
    %390 = arith.mulf %388, %389 : vector<4x32xf32>
    %391 = arith.addf %385, %390 : vector<4x32xf32>
    %392 = vector.extract_strided_slice %348 {offsets = [0, 7], sizes = [4, 1], strides = [1, 1]} : vector<4x8xf32> to vector<4x1xf32>
    %393 = vector.extract_strided_slice %2 {offsets = [7, 0], sizes = [1, 32], strides = [1, 1]} : vector<8x32xf32> to vector<1x32xf32>
    %394 = vector.broadcast %392 : vector<4x1xf32> to vector<4x32xf32>
    %395 = vector.broadcast %393 : vector<1x32xf32> to vector<4x32xf32>
    %396 = arith.mulf %394, %395 : vector<4x32xf32>
    %397 = arith.addf %391, %396 : vector<4x32xf32>
    %398 = arith.negf %397 : vector<4x32xf32>
    %399 = math.exp %398 : vector<4x32xf32>
    %cst_21 = arith.constant 1.000000e+00 : f32
    %400 = vector.broadcast %cst_21 : f32 to vector<4x32xf32>
    %401 = arith.addf %400, %399 : vector<4x32xf32>
    %402 = arith.divf %400, %401 : vector<4x32xf32>
    %403 = vector.extract_strided_slice %402 {offsets = [0, 0], sizes = [4, 8], strides = [1, 1]} : vector<4x32xf32> to vector<4x8xf32>
    %404 = vector.extract_strided_slice %402 {offsets = [0, 8], sizes = [4, 8], strides = [1, 1]} : vector<4x32xf32> to vector<4x8xf32>
    %405 = vector.extract_strided_slice %402 {offsets = [0, 16], sizes = [4, 8], strides = [1, 1]} : vector<4x32xf32> to vector<4x8xf32>
    %cst_22 = arith.constant 2.000000e+00 : f32
    %406 = vector.broadcast %cst_22 : f32 to vector<4x8xf32>
    %407 = arith.mulf %406, %405 : vector<4x8xf32>
    %cst_23 = arith.constant 1.000000e+00 : f32
    %408 = vector.broadcast %cst_23 : f32 to vector<4x8xf32>
    %409 = arith.subf %407, %408 : vector<4x8xf32>
    %410 = vector.extract_strided_slice %402 {offsets = [0, 24], sizes = [4, 8], strides = [1, 1]} : vector<4x32xf32> to vector<4x8xf32>
    %411 = arith.mulf %404, %346 : vector<4x8xf32>
    %412 = arith.mulf %403, %409 : vector<4x8xf32>
    %413 = arith.addf %411, %412 : vector<4x8xf32>
    %414 = math.tanh %413 : vector<4x8xf32>
    %415 = arith.mulf %410, %414 : vector<4x8xf32>
    %416 = vector.extract_strided_slice %11 {offsets = [24, 0], sizes = [4, 32], strides = [1, 1]} : vector<32x32xf32> to vector<4x32xf32>
    %417 = vector.extract_strided_slice %415 {offsets = [0, 0], sizes = [4, 1], strides = [1, 1]} : vector<4x8xf32> to vector<4x1xf32>
    %418 = vector.extract_strided_slice %2 {offsets = [0, 0], sizes = [1, 32], strides = [1, 1]} : vector<8x32xf32> to vector<1x32xf32>
    %419 = vector.broadcast %417 : vector<4x1xf32> to vector<4x32xf32>
    %420 = vector.broadcast %418 : vector<1x32xf32> to vector<4x32xf32>
    %421 = arith.mulf %419, %420 : vector<4x32xf32>
    %422 = arith.addf %416, %421 : vector<4x32xf32>
    %423 = vector.extract_strided_slice %415 {offsets = [0, 1], sizes = [4, 1], strides = [1, 1]} : vector<4x8xf32> to vector<4x1xf32>
    %424 = vector.extract_strided_slice %2 {offsets = [1, 0], sizes = [1, 32], strides = [1, 1]} : vector<8x32xf32> to vector<1x32xf32>
    %425 = vector.broadcast %423 : vector<4x1xf32> to vector<4x32xf32>
    %426 = vector.broadcast %424 : vector<1x32xf32> to vector<4x32xf32>
    %427 = arith.mulf %425, %426 : vector<4x32xf32>
    %428 = arith.addf %422, %427 : vector<4x32xf32>
    %429 = vector.extract_strided_slice %415 {offsets = [0, 2], sizes = [4, 1], strides = [1, 1]} : vector<4x8xf32> to vector<4x1xf32>
    %430 = vector.extract_strided_slice %2 {offsets = [2, 0], sizes = [1, 32], strides = [1, 1]} : vector<8x32xf32> to vector<1x32xf32>
    %431 = vector.broadcast %429 : vector<4x1xf32> to vector<4x32xf32>
    %432 = vector.broadcast %430 : vector<1x32xf32> to vector<4x32xf32>
    %433 = arith.mulf %431, %432 : vector<4x32xf32>
    %434 = arith.addf %428, %433 : vector<4x32xf32>
    %435 = vector.extract_strided_slice %415 {offsets = [0, 3], sizes = [4, 1], strides = [1, 1]} : vector<4x8xf32> to vector<4x1xf32>
    %436 = vector.extract_strided_slice %2 {offsets = [3, 0], sizes = [1, 32], strides = [1, 1]} : vector<8x32xf32> to vector<1x32xf32>
    %437 = vector.broadcast %435 : vector<4x1xf32> to vector<4x32xf32>
    %438 = vector.broadcast %436 : vector<1x32xf32> to vector<4x32xf32>
    %439 = arith.mulf %437, %438 : vector<4x32xf32>
    %440 = arith.addf %434, %439 : vector<4x32xf32>
    %441 = vector.extract_strided_slice %415 {offsets = [0, 4], sizes = [4, 1], strides = [1, 1]} : vector<4x8xf32> to vector<4x1xf32>
    %442 = vector.extract_strided_slice %2 {offsets = [4, 0], sizes = [1, 32], strides = [1, 1]} : vector<8x32xf32> to vector<1x32xf32>
    %443 = vector.broadcast %441 : vector<4x1xf32> to vector<4x32xf32>
    %444 = vector.broadcast %442 : vector<1x32xf32> to vector<4x32xf32>
    %445 = arith.mulf %443, %444 : vector<4x32xf32>
    %446 = arith.addf %440, %445 : vector<4x32xf32>
    %447 = vector.extract_strided_slice %415 {offsets = [0, 5], sizes = [4, 1], strides = [1, 1]} : vector<4x8xf32> to vector<4x1xf32>
    %448 = vector.extract_strided_slice %2 {offsets = [5, 0], sizes = [1, 32], strides = [1, 1]} : vector<8x32xf32> to vector<1x32xf32>
    %449 = vector.broadcast %447 : vector<4x1xf32> to vector<4x32xf32>
    %450 = vector.broadcast %448 : vector<1x32xf32> to vector<4x32xf32>
    %451 = arith.mulf %449, %450 : vector<4x32xf32>
    %452 = arith.addf %446, %451 : vector<4x32xf32>
    %453 = vector.extract_strided_slice %415 {offsets = [0, 6], sizes = [4, 1], strides = [1, 1]} : vector<4x8xf32> to vector<4x1xf32>
    %454 = vector.extract_strided_slice %2 {offsets = [6, 0], sizes = [1, 32], strides = [1, 1]} : vector<8x32xf32> to vector<1x32xf32>
    %455 = vector.broadcast %453 : vector<4x1xf32> to vector<4x32xf32>
    %456 = vector.broadcast %454 : vector<1x32xf32> to vector<4x32xf32>
    %457 = arith.mulf %455, %456 : vector<4x32xf32>
    %458 = arith.addf %452, %457 : vector<4x32xf32>
    %459 = vector.extract_strided_slice %415 {offsets = [0, 7], sizes = [4, 1], strides = [1, 1]} : vector<4x8xf32> to vector<4x1xf32>
    %460 = vector.extract_strided_slice %2 {offsets = [7, 0], sizes = [1, 32], strides = [1, 1]} : vector<8x32xf32> to vector<1x32xf32>
    %461 = vector.broadcast %459 : vector<4x1xf32> to vector<4x32xf32>
    %462 = vector.broadcast %460 : vector<1x32xf32> to vector<4x32xf32>
    %463 = arith.mulf %461, %462 : vector<4x32xf32>
    %464 = arith.addf %458, %463 : vector<4x32xf32>
    %465 = arith.negf %464 : vector<4x32xf32>
    %466 = math.exp %465 : vector<4x32xf32>
    %cst_24 = arith.constant 1.000000e+00 : f32
    %467 = vector.broadcast %cst_24 : f32 to vector<4x32xf32>
    %468 = arith.addf %467, %466 : vector<4x32xf32>
    %469 = arith.divf %467, %468 : vector<4x32xf32>
    %470 = vector.extract_strided_slice %469 {offsets = [0, 0], sizes = [4, 8], strides = [1, 1]} : vector<4x32xf32> to vector<4x8xf32>
    %471 = vector.extract_strided_slice %469 {offsets = [0, 8], sizes = [4, 8], strides = [1, 1]} : vector<4x32xf32> to vector<4x8xf32>
    %472 = vector.extract_strided_slice %469 {offsets = [0, 16], sizes = [4, 8], strides = [1, 1]} : vector<4x32xf32> to vector<4x8xf32>
    %cst_25 = arith.constant 2.000000e+00 : f32
    %473 = vector.broadcast %cst_25 : f32 to vector<4x8xf32>
    %474 = arith.mulf %473, %472 : vector<4x8xf32>
    %cst_26 = arith.constant 1.000000e+00 : f32
    %475 = vector.broadcast %cst_26 : f32 to vector<4x8xf32>
    %476 = arith.subf %474, %475 : vector<4x8xf32>
    %477 = vector.extract_strided_slice %469 {offsets = [0, 24], sizes = [4, 8], strides = [1, 1]} : vector<4x32xf32> to vector<4x8xf32>
    %478 = arith.mulf %471, %413 : vector<4x8xf32>
    %479 = arith.mulf %470, %476 : vector<4x8xf32>
    %480 = arith.addf %478, %479 : vector<4x8xf32>
    %481 = math.tanh %480 : vector<4x8xf32>
    %482 = arith.mulf %477, %481 : vector<4x8xf32>
    %483 = vector.extract_strided_slice %11 {offsets = [28, 0], sizes = [4, 32], strides = [1, 1]} : vector<32x32xf32> to vector<4x32xf32>
    %484 = vector.extract_strided_slice %482 {offsets = [0, 0], sizes = [4, 1], strides = [1, 1]} : vector<4x8xf32> to vector<4x1xf32>
    %485 = vector.extract_strided_slice %2 {offsets = [0, 0], sizes = [1, 32], strides = [1, 1]} : vector<8x32xf32> to vector<1x32xf32>
    %486 = vector.broadcast %484 : vector<4x1xf32> to vector<4x32xf32>
    %487 = vector.broadcast %485 : vector<1x32xf32> to vector<4x32xf32>
    %488 = arith.mulf %486, %487 : vector<4x32xf32>
    %489 = arith.addf %483, %488 : vector<4x32xf32>
    %490 = vector.extract_strided_slice %482 {offsets = [0, 1], sizes = [4, 1], strides = [1, 1]} : vector<4x8xf32> to vector<4x1xf32>
    %491 = vector.extract_strided_slice %2 {offsets = [1, 0], sizes = [1, 32], strides = [1, 1]} : vector<8x32xf32> to vector<1x32xf32>
    %492 = vector.broadcast %490 : vector<4x1xf32> to vector<4x32xf32>
    %493 = vector.broadcast %491 : vector<1x32xf32> to vector<4x32xf32>
    %494 = arith.mulf %492, %493 : vector<4x32xf32>
    %495 = arith.addf %489, %494 : vector<4x32xf32>
    %496 = vector.extract_strided_slice %482 {offsets = [0, 2], sizes = [4, 1], strides = [1, 1]} : vector<4x8xf32> to vector<4x1xf32>
    %497 = vector.extract_strided_slice %2 {offsets = [2, 0], sizes = [1, 32], strides = [1, 1]} : vector<8x32xf32> to vector<1x32xf32>
    %498 = vector.broadcast %496 : vector<4x1xf32> to vector<4x32xf32>
    %499 = vector.broadcast %497 : vector<1x32xf32> to vector<4x32xf32>
    %500 = arith.mulf %498, %499 : vector<4x32xf32>
    %501 = arith.addf %495, %500 : vector<4x32xf32>
    %502 = vector.extract_strided_slice %482 {offsets = [0, 3], sizes = [4, 1], strides = [1, 1]} : vector<4x8xf32> to vector<4x1xf32>
    %503 = vector.extract_strided_slice %2 {offsets = [3, 0], sizes = [1, 32], strides = [1, 1]} : vector<8x32xf32> to vector<1x32xf32>
    %504 = vector.broadcast %502 : vector<4x1xf32> to vector<4x32xf32>
    %505 = vector.broadcast %503 : vector<1x32xf32> to vector<4x32xf32>
    %506 = arith.mulf %504, %505 : vector<4x32xf32>
    %507 = arith.addf %501, %506 : vector<4x32xf32>
    %508 = vector.extract_strided_slice %482 {offsets = [0, 4], sizes = [4, 1], strides = [1, 1]} : vector<4x8xf32> to vector<4x1xf32>
    %509 = vector.extract_strided_slice %2 {offsets = [4, 0], sizes = [1, 32], strides = [1, 1]} : vector<8x32xf32> to vector<1x32xf32>
    %510 = vector.broadcast %508 : vector<4x1xf32> to vector<4x32xf32>
    %511 = vector.broadcast %509 : vector<1x32xf32> to vector<4x32xf32>
    %512 = arith.mulf %510, %511 : vector<4x32xf32>
    %513 = arith.addf %507, %512 : vector<4x32xf32>
    %514 = vector.extract_strided_slice %482 {offsets = [0, 5], sizes = [4, 1], strides = [1, 1]} : vector<4x8xf32> to vector<4x1xf32>
    %515 = vector.extract_strided_slice %2 {offsets = [5, 0], sizes = [1, 32], strides = [1, 1]} : vector<8x32xf32> to vector<1x32xf32>
    %516 = vector.broadcast %514 : vector<4x1xf32> to vector<4x32xf32>
    %517 = vector.broadcast %515 : vector<1x32xf32> to vector<4x32xf32>
    %518 = arith.mulf %516, %517 : vector<4x32xf32>
    %519 = arith.addf %513, %518 : vector<4x32xf32>
    %520 = vector.extract_strided_slice %482 {offsets = [0, 6], sizes = [4, 1], strides = [1, 1]} : vector<4x8xf32> to vector<4x1xf32>
    %521 = vector.extract_strided_slice %2 {offsets = [6, 0], sizes = [1, 32], strides = [1, 1]} : vector<8x32xf32> to vector<1x32xf32>
    %522 = vector.broadcast %520 : vector<4x1xf32> to vector<4x32xf32>
    %523 = vector.broadcast %521 : vector<1x32xf32> to vector<4x32xf32>
    %524 = arith.mulf %522, %523 : vector<4x32xf32>
    %525 = arith.addf %519, %524 : vector<4x32xf32>
    %526 = vector.extract_strided_slice %482 {offsets = [0, 7], sizes = [4, 1], strides = [1, 1]} : vector<4x8xf32> to vector<4x1xf32>
    %527 = vector.extract_strided_slice %2 {offsets = [7, 0], sizes = [1, 32], strides = [1, 1]} : vector<8x32xf32> to vector<1x32xf32>
    %528 = vector.broadcast %526 : vector<4x1xf32> to vector<4x32xf32>
    %529 = vector.broadcast %527 : vector<1x32xf32> to vector<4x32xf32>
    %530 = arith.mulf %528, %529 : vector<4x32xf32>
    %531 = arith.addf %525, %530 : vector<4x32xf32>
    %532 = arith.negf %531 : vector<4x32xf32>
    %533 = math.exp %532 : vector<4x32xf32>
    %cst_27 = arith.constant 1.000000e+00 : f32
    %534 = vector.broadcast %cst_27 : f32 to vector<4x32xf32>
    %535 = arith.addf %534, %533 : vector<4x32xf32>
    %536 = arith.divf %534, %535 : vector<4x32xf32>
    %537 = vector.extract_strided_slice %536 {offsets = [0, 0], sizes = [4, 8], strides = [1, 1]} : vector<4x32xf32> to vector<4x8xf32>
    %538 = vector.extract_strided_slice %536 {offsets = [0, 8], sizes = [4, 8], strides = [1, 1]} : vector<4x32xf32> to vector<4x8xf32>
    %539 = vector.extract_strided_slice %536 {offsets = [0, 16], sizes = [4, 8], strides = [1, 1]} : vector<4x32xf32> to vector<4x8xf32>
    %cst_28 = arith.constant 2.000000e+00 : f32
    %540 = vector.broadcast %cst_28 : f32 to vector<4x8xf32>
    %541 = arith.mulf %540, %539 : vector<4x8xf32>
    %cst_29 = arith.constant 1.000000e+00 : f32
    %542 = vector.broadcast %cst_29 : f32 to vector<4x8xf32>
    %543 = arith.subf %541, %542 : vector<4x8xf32>
    %544 = vector.extract_strided_slice %536 {offsets = [0, 24], sizes = [4, 8], strides = [1, 1]} : vector<4x32xf32> to vector<4x8xf32>
    %545 = arith.mulf %538, %480 : vector<4x8xf32>
    %546 = arith.mulf %537, %543 : vector<4x8xf32>
    %547 = arith.addf %545, %546 : vector<4x8xf32>
    %548 = math.tanh %547 : vector<4x8xf32>
    %549 = arith.mulf %544, %548 : vector<4x8xf32>
    %cst_30 = arith.constant dense<0.000000e+00> : vector<4x32xf32>
    %550 = tpu.matmul %549, %3, %cst_30 {dimension_numbers = #tpu.dot_dimension_numbers<[1], [0], [0], [1], [0, 0, 1, 1], [], []>} : vector<4x8xf32>, vector<8x32xf32>, vector<4x32xf32> -> vector<4x32xf32>
    %551 = vector.broadcast %4 : vector<1x32xf32> to vector<4x32xf32>
    %552 = arith.addf %550, %551 : vector<4x32xf32>
    %c0_31 = arith.constant 0 : index
    %c0_32 = arith.constant 0 : index
    %553 = vector.load %arg3[%c0_31, %c0_32] : memref<4x48xf32, #tpu.memory_space<vmem>>, vector<4x32xf32>
    tpu.vector_store %arg3[%c0_31, %c0_32], %552 {strides = array<i32>} : memref<4x48xf32, #tpu.memory_space<vmem>>, vector<4x32xf32>,
    %c0_33 = arith.constant 0 : index
    %c32 = arith.constant 32 : index
    %554 = vector.load %arg3[%c0_33, %c32] : memref<4x48xf32, #tpu.memory_space<vmem>>, vector<4x8xf32>
    tpu.vector_store %arg3[%c0_33, %c32], %549 {strides = array<i32>} : memref<4x48xf32, #tpu.memory_space<vmem>>, vector<4x8xf32>,
    %c0_34 = arith.constant 0 : index
    %c40 = arith.constant 40 : index
    %555 = vector.load %arg3[%c0_34, %c40] : memref<4x48xf32, #tpu.memory_space<vmem>>, vector<4x8xf32>
    tpu.vector_store %arg3[%c0_34, %c40], %547 {strides = array<i32>} : memref<4x48xf32, #tpu.memory_space<vmem>>, vector<4x8xf32>,
    return
  }
}

</mosaic_0001>

<bundles_post_ra>
// kernel: tpu_custom_call.1
= control target key start
LH: loop header
LB: loop body
LE: loop exit
PB: predicated region body
PF: predicated region fallthrough
CT: control target
= control target key end

     0   :  { %v1446_v2 = vmov 0   ;;  %s1847_s0 = inlined_call_operand.vmem [shape: s32[32,1], index: 0, kind: input, shape index: {}]   ;;  %s1848_s1 = inlined_call_operand.vmem [shape: f32[32,128], index: 1, kind: input, shape index: {}]   ;;  %s1849_s2 = inlined_call_operand.vmem [shape: f32[4,16], index: 2, kind: input, shape index: {}]   ;;  %s1850_s3 = inlined_call_operand.hbm [shape: f32[4,48], index: 3, kind: output, shape index: {}]  }
   0x1   :  { %v19_v0 = vld [vmem:[%s1847_s0] sm:$0xff]  ;;  %1305 = vset.pattern.permute.xlu0 %v1446_v2  ;;  %1306 = vset.pattern.permute.xlu1 %v1446_v2  ;;  %v16_v4 = vld [vmem:[%s1848_s1 + $0x8] sm:$0xff]  ;;  %v17_v6 = vld [vmem:[%s1848_s1 + $0x10] sm:$0xff] }
   0x2   :  { %v1498_v1 = vld [vmem:[%s1849_s2] sm:$0xf]  ;;  %26 = vperm.xlu0 %1305, %v19_v0   ;;  %v18_v7 = vld [vmem:[%s1848_s1 + $0x18] sm:$0xff]  ;;  %v20_v8 = vld [vmem:[%s1847_s0 + $0x8] sm:$0xff] }
   0x3   :  { %v1505_v3 = vld [vmem:[%s1848_s1] sm:$0xff]  ;;  %150 = vperm.xlu1 %1306, %v1498_v1   ;;  %v1275_v9 = vpack.c.bf16 %v18_v7, %v17_v6 }
   0x4   :  { %v1271_v5 = vpack.c.bf16 %v16_v4, %v1505_v3 }
   0x5   :  { %8 = vsyncpa [#allocation3], 0  ;;  %v1447_v10 = vmov 0.0   ;;  %v1448_v11 = vmov 1   ;;  %v1449_v12 = vmov 2   ;;  %v1450_v13 = vmov 3  }
   0x6   :  { %1272 = vmatprep.subr.bf16.mxu0 %v1271_v5  ;;  %1266 = vmatprep.subr.mxu1 %v1447_v10  ;;  %v1451_v14 = vmov 5   ;;  %v1452_v15 = vmov 4   ;;  %v1453_v16 = vmov 6   ;;  %v1454_v17 = vmov 7   ;;  %s1455_s25 = smov 96   ;;  %s1456_s26 = smov 112  }
   0x7   :  { %1274 = vmatpush3.bf16.msra.mxu0 %v1271_v5  ;;  %29 = vperm.xlu0 %1305, %v20_v8   ;;  %v23_v18 = vlaneseq  ;;  %vm49_vm0 = vcmask 261120   ;;  %s1457_s27 = smov 8   ;;  %s1460_s28 = smov 16   ;;  %vm1469_vm5 = vmmov 0   ;;  %vm1117_vm6 = vcmask 64512  }
   0x8   :  { %1307 = vset.pattern.permute.xlu1 %v1448_v11  ;;  %1276 = vmatprep.subr.bf16.mxu0 %v1275_v9  ;;  %s1467_s7 = smov 64   ;;  %s1468_s8 = smov 32   ;;  %vm1190_vm7 = vcmask 257024   ;;  %vm1195_vm8 = vcmask 326916   ;;  %vm1201_vm9 = vcmask 392516  }
   0x9   :  { %164 = vperm.xlu1 %1307, %v1498_v1   ;;  %v154_v19 = vshrl.u32 %v23_v18, 7  ;;  %v1529_v21 = vand.u32 127, %v23_v18  ;;  %1268 = vmatprep.mubr.msk.f32.mxu1 %vm1469_vm5, %v1447_v10  ;;  %s1471_s9 = smov [#allocation2]  }
   0xa   :  { %s1209_s10 = sshll.u32 %s1471_s9, 4  ;;  %s1210_s10 = int_to_ptr.vmem [resolvable:$true] %s1209_s10 }
   0xb   :  { %1278 = vmatpush3.bf16.msra.mxu0 %v1275_v9  ;;  %1308 = vset.pattern.permute.xlu0 %v1449_v12  ;;  %v155_v20 = vsub.s32 0, %v154_v19  ;;  %v169_v23 = vsub.s32 1, %v154_v19  ;;  %v183_v29 = vsub.s32 2, %v154_v19  ;;  %v197_v30 = vsub.s32 3, %v154_v19  ;;  %s1422_s11 = scalar_lea.vmem %s1210_s10, 64  ;;  %p1427_p1 = scmp.lt.s32.totalorder %s1210_s10, %s1210_s10 }
   0xc   :  { %178 = vperm.xlu0 %1308, %v1498_v1   ;;  %v225_v37 = vsub.s32 5, %v154_v19  ;;  %v211_v38 = vsub.s32 4, %v154_v19  ;;  %v239_v45 = vsub.s32 6, %v154_v19  ;;  %v253_v51 = vsub.s32 7, %v154_v19  ;;  %p1423_p0 = scmp.ne.s32.totalorder %s1210_s10, %s1422_s11  ;;  %p1428_p2 = scmp.lt.s32.totalorder %s1422_s11, %s1422_s11 }
   0xd   :  { %1309 = vset.pattern.permute.xlu1 %v1450_v13  ;;  %v1532_v22 = vrot.slane %v1505_v3, %v155_v20  ;;  %v1538_v28 = vrot.slane %v1505_v3, %v169_v23  ;;  %v1546_v35 = vrot.slane %v1505_v3, %v183_v29  ;;  %v1550_v36 = vrot.slane %v1505_v3, %v197_v30 }
   0xe   :  { %192 = vperm.xlu1 %1309, %v1498_v1   ;;  %v1556_v43 = vrot.slane %v1505_v3, %v225_v37  ;;  %v1560_v44 = vrot.slane %v1505_v3, %v211_v38  ;;  %v1566_v50 = vrot.slane %v1505_v3, %v239_v45  ;;  %v1572_v54 = vrot.slane %v1505_v3, %v253_v51  ;;  %p1429_p3 = por %p1428_p2, %p1427_p1 }
   0xf   :  { %v1459_v29 = vmov 25   ;;  %v1464_v37 = vmov 27   ;;  %v1465_v38 = vmov 29  }
  0x10   :  { %1311 = vset.pattern.permute.xlu0 %v1451_v14  ;;  %p1430_p4 = pnand %p1429_p3, %p1423_p0 }
  0x11   :  { %220 = vperm.xlu0 %1311, %v1498_v1  }
  0x12   :  { %1310 = vset.pattern.permute.xlu1 %v1452_v15 }
  0x13   :  { %206 = vperm.xlu1 %1310, %v1498_v1  }
  0x15   :  { %1315 = vset.pattern.permute.xlu0 %v1459_v29 }
  0x17   :  { %1312 = vset.pattern.permute.xlu1 %v1453_v16 }
  0x18   :  { %234 = vperm.xlu1 %1312, %v1498_v1  }
  0x1c   :  { %1313 = vset.pattern.permute.xlu1 %v1454_v17 }
  0x1d   :  { %248 = vperm.xlu1 %1313, %v1498_v1  }
  0x81   :  { %v27_v24 = vpop.permute.xlu0 %26 }
  0x82   :  { %v151_v25 = vpop.permute.xlu1 %150  ;;  %vm37_vm1 = vcmp.eq.s32.totalorder %v27_v24, %v1529_v21 }
  0x83   :  { %v157_v26 = vmul.f32 %v1532_v22, %v151_v25  ;;  %v1217_v27 = vsel %vm37_vm1, 1.0, %v1447_v10 }
  0x84   :  { %1260 = vmatprep.mubr.msk.f32.mxu0 %vm49_vm0, %v1217_v27  ;;  %v1458_v27 = vmov 24  }
  0x85   :  { %159 = vrot.lane.b32.xlu0 %v157_v26, %s1455_s25  ;;  %1314 = vset.pattern.permute.xlu1 %v1458_v27 }
  0x86   :  { %v30_v31 = vpop.permute.xlu0 %29 }
  0x87   :  { %vm38_vm2 = vcmp.eq.s32.totalorder %v30_v31, %v1529_v21 }
  0x88   :  { %v165_v32 = vpop.permute.xlu1 %164  ;;  %v1218_v33 = vsel %vm38_vm2, 1.0, %v1447_v10 }
  0x89   :  { %v171_v34 = vmul.f32 %v1538_v28, %v165_v32  ;;  %1261 = vmatmul.mubr.msk.f32.vlgmr.msra.gmra.mrb[0].mxu0 %vm49_vm0, %v1218_v33  ;;  %v1462_v33 = vmov 26  }
  0x8b   :  { %173 = vrot.lane.b32.xlu1 %v171_v34, %s1455_s25  ;;  %v179_v39 = vpop.permute.xlu0 %178  ;;  %v1463_v34 = vmov 31  }
  0x8c   :  { %v185_v41 = vmul.f32 %v1546_v35, %v179_v39  ;;  %v1466_v39 = vmov 30  }
  0x8d   :  { %v193_v40 = vpop.permute.xlu1 %192 }
  0x8e   :  { %v199_v42 = vmul.f32 %v1550_v36, %v193_v40  ;;  %187 = vrot.lane.b32.xlu0 %v185_v41, %s1455_s25 }
  0x90   :  { %201 = vrot.lane.b32.xlu1 %v199_v42, %s1455_s25  ;;  %v221_v46 = vpop.permute.xlu0 %220 }
  0x91   :  { %v227_v48 = vmul.f32 %v1556_v43, %v221_v46 }
  0x92   :  { %v207_v47 = vpop.permute.xlu1 %206 }
  0x93   :  { %v213_v49 = vmul.f32 %v1560_v44, %v207_v47 }
  0x94   :  { %229 = vrot.lane.b32.xlu1 %v227_v48, %s1455_s25 }
  0x95   :  { %215 = vrot.lane.b32.xlu0 %v213_v49, %s1455_s25 }
  0x97   :  { %v235_v52 = vpop.permute.xlu1 %234 }
  0x98   :  { %v241_v53 = vmul.f32 %v1566_v50, %v235_v52 }
  0x9a   :  { %243 = vrot.lane.b32.xlu0 %v241_v53, %s1455_s25 }
  0x9c   :  { %v249_v55 = vpop.permute.xlu1 %248 }
  0x9d   :  { %v255_v56 = vmul.f32 %v1572_v54, %v249_v55 }
  0x9f   :  { %257 = vrot.lane.b32.xlu1 %v255_v56, %s1455_s25 }
  0xf7   :  { %v160_v57 = vpop.permute.xlu0 %159 }
  0xfd   :  { %v174_v58 = vpop.permute.xlu1 %173 }
 0x100   :  { %v188_v60 = vpop.permute.xlu0 %187 }
 0x102   :  { %v202_v63 = vpop.permute.xlu1 %201 }
 0x106   :  { %v230_v5 = vpop.permute.xlu1 %229 }
 0x107   :  { %v216_v4 = vpop.permute.xlu0 %215 }
 0x10c   :  { %v244_v9 = vpop.permute.xlu0 %243 }
 0x111   :  { %v258_v11 = vpop.permute.xlu1 %257 }
 0x15c   :  { %v1577_v59 = vpop.f32.mrb[0].mxu0 }
 0x15d   :  { %v1579_v61 = vpop.f32.mrb[1].mxu0 }
 0x15e   :  { %v162_v62 = vadd.f32 %v160_v57, %v1579_v61 }
 0x160   :  { %v176_v0 = vadd.f32 %v174_v58, %v162_v62 }
 0x162   :  { %v190_v3 = vadd.f32 %v188_v60, %v176_v0 }
 0x164   :  { %v204_v6 = vadd.f32 %v202_v63, %v190_v3 }
 0x166   :  { %v218_v7 = vadd.f32 %v216_v4, %v204_v6 }
 0x168   :  { %v232_v8 = vadd.f32 %v230_v5, %v218_v7 }
 0x16a   :  { %v246_v12 = vadd.f32 %v244_v9, %v232_v8 }
 0x16c   :  { %v260_v13 = vadd.f32 %v258_v11, %v246_v12 }
 0x16e   :  { %v1225_v14 = vmul.f32 -1.442695, %v260_v13 }
 0x170   :  { %1373 = vpow2.f32 %v1225_v14 }
 0x17a   :  { %v1374_v15 = vpop.eup %1373 }
 0x17b   :  { %v264_v16 = vadd.f32 1.0, %v1374_v15 }
 0x17d   :  { %1375 = vrcp.f32 %v264_v16 }
 0x187   :  { %v1376_v17 = vpop.eup %1375 }
 0x188   :  { %v267_v18 = vmul.f32 2.0, %v1376_v17  ;;  %v269_v24 = vmul.f32 %v1376_v17, %v1498_v1  ;;  %v1461_v1 = vmov 28  }
 0x18a   :  { %v1226_v19 = vadd.f32 -1.0, %v267_v18 }
 0x18c   :  { %271 = vrot.lane.b32.xlu0 %v1226_v19, %s1456_s26 }
 0x1fe   :  { %v272_v20 = vpop.permute.xlu0 %271 }
 0x1ff   :  { %v274_v23 = vmul.f32 %v1376_v17, %v272_v20 }
 0x201   :  { %276 = vrot.lane.b32.xlu1 %v274_v23, %s1457_s27 }
 0x273   :  { %v277_v25 = vpop.permute.xlu1 %276 }
 0x274   :  { %v1585_v26 = vadd.f32 %v277_v25, %v269_v24 }
 0x276   :  { %1377 = vtanh.f32 %v1585_v26 }
 0x280   :  { %v1378_v30 = vpop.eup %1377 }
 0x281   :  { %282 = vrot.lane.b32.xlu0 %v1378_v30, %s1460_s28 }
 0x2f3   :  { %v283_v31 = vpop.permute.xlu0 %282 }
 0x2f4   :  { %v285_v32 = vmul.f32 %v1376_v17, %v283_v31 }
 0x2f6   :  { %299 = vperm.xlu0 %1315, %v285_v32   ;;  %288 = vperm.xlu1 %1314, %v285_v32  }
 0x2fa   :  { %1318 = vset.pattern.permute.xlu0 %v1461_v1  ;;  %1316 = vset.pattern.permute.xlu1 %v1462_v33 }
 0x2fb   :  { %332 = vperm.xlu0 %1318, %v285_v32   ;;  %310 = vperm.xlu1 %1316, %v285_v32  }
 0x2ff   :  { %1321 = vset.pattern.permute.xlu0 %v1463_v34  ;;  %1317 = vset.pattern.permute.xlu1 %v1464_v37 }
 0x300   :  { %365 = vperm.xlu0 %1321, %v285_v32   ;;  %321 = vperm.xlu1 %1317, %v285_v32  }
 0x304   :  { %1319 = vset.pattern.permute.xlu1 %v1465_v38  ;;  %1323 = vset.pattern.permute.xlu0 %v1459_v29 }
 0x305   :  { %343 = vperm.xlu1 %1319, %v285_v32  }
 0x309   :  { %1320 = vset.pattern.permute.xlu1 %v1466_v39 }
 0x30a   :  { %354 = vperm.xlu1 %1320, %v285_v32  }
 0x30e   :  { %1322 = vset.pattern.permute.xlu1 %v1458_v27 }
 0x375   :  { %v300_v40 = vpop.permute.xlu0 %299  ;;  %v289_v41 = vpop.permute.xlu1 %288 }
 0x376   :  { %v291_v42 = vmul.f32 %v289_v41, %v1532_v22  ;;  %v302_v45 = vmul.f32 %v300_v40, %v1538_v28 }
 0x378   :  { %v293_v46 = vrot.slane %v291_v42, 4  ;;  %v304_v51 = vrot.slane %v302_v45, 4 }
 0x37a   :  { %v333_v47 = vpop.permute.xlu0 %332  ;;  %294 = vrot.lane.b32.xlu1 %v293_v46, %s1455_s25  ;;  %v311_v48 = vpop.permute.xlu1 %310 }
 0x37b   :  { %v313_v49 = vmul.f32 %v311_v48, %v1546_v35  ;;  %v335_v52 = vmul.f32 %v333_v47, %v1560_v44  ;;  %v384_v47 = vrot.slane %v1585_v26, 4 }
 0x37d   :  { %v315_v53 = vrot.slane %v313_v49, 4  ;;  %v337_v57 = vrot.slane %v335_v52, 4 }
 0x37e   :  { %305 = vrot.lane.b32.xlu1 %v304_v51, %s1455_s25 }
 0x37f   :  { %316 = vrot.lane.b32.xlu0 %v315_v53, %s1455_s25  ;;  %v322_v55 = vpop.permute.xlu1 %321  ;;  %v366_v60 = vpop.permute.xlu0 %365 }
 0x380   :  { %v324_v56 = vmul.f32 %v322_v55, %v1550_v36  ;;  %v368_v0 = vmul.f32 %v366_v60, %v1572_v54 }
 0x382   :  { %v326_v58 = vrot.slane %v324_v56, 4  ;;  %v370_v6 = vrot.slane %v368_v0, 4 }
 0x383   :  { %338 = vrot.lane.b32.xlu0 %v337_v57, %s1455_s25 }
 0x384   :  { %327 = vrot.lane.b32.xlu1 %v326_v58, %s1455_s25  ;;  %v344_v62 = vpop.permute.xlu1 %343 }
 0x385   :  { %v346_v63 = vmul.f32 %v344_v62, %v1556_v43 }
 0x387   :  { %v348_v3 = vrot.slane %v346_v63, 4 }
 0x389   :  { %349 = vrot.lane.b32.xlu1 %v348_v3, %s1455_s25  ;;  %v355_v4 = vpop.permute.xlu1 %354 }
 0x38a   :  { %v357_v5 = vmul.f32 %v355_v4, %v1566_v50 }
 0x38c   :  { %v359_v7 = vrot.slane %v357_v5, 4 }
 0x38d   :  { %371 = vrot.lane.b32.xlu1 %v370_v6, %s1455_s25 }
 0x38e   :  { %360 = vrot.lane.b32.xlu0 %v359_v7, %s1455_s25 }
 0x3ec   :  { %v295_v8 = vpop.permute.xlu1 %294 }
 0x3ed   :  { %v297_v9 = vadd.f32 %v295_v8, %v1579_v61 }
 0x3f0   :  { %v306_v11 = vpop.permute.xlu1 %305 }
 0x3f1   :  { %v308_v12 = vadd.f32 %v306_v11, %v297_v9  ;;  %v317_v13 = vpop.permute.xlu0 %316 }
 0x3f3   :  { %v319_v14 = vadd.f32 %v317_v13, %v308_v12 }
 0x3f5   :  { %v339_v17 = vpop.permute.xlu0 %338 }
 0x3f6   :  { %v328_v15 = vpop.permute.xlu1 %327 }
 0x3f7   :  { %v330_v16 = vadd.f32 %v328_v15, %v319_v14 }
 0x3f9   :  { %v341_v18 = vadd.f32 %v339_v17, %v330_v16 }
 0x3fb   :  { %v350_v19 = vpop.permute.xlu1 %349 }
 0x3fc   :  { %v352_v20 = vadd.f32 %v350_v19, %v341_v18 }
 0x3ff   :  { %v372_v25 = vpop.permute.xlu1 %371 }
 0x400   :  { %v361_v23 = vpop.permute.xlu0 %360 }
 0x401   :  { %v363_v24 = vadd.f32 %v361_v23, %v352_v20 }
 0x403   :  { %v374_v30 = vadd.f32 %v372_v25, %v363_v24 }
 0x405   :  { %v1227_v31 = vmul.f32 -1.442695, %v374_v30 }
 0x407   :  { %1379 = vpow2.f32 %v1227_v31 }
 0x411   :  { %v1380_v32 = vpop.eup %1379 }
 0x412   :  { %v378_v40 = vadd.f32 1.0, %v1380_v32 }
 0x414   :  { %1381 = vrcp.f32 %v378_v40 }
 0x41e   :  { %v1382_v61 = vpop.eup %1381 }
 0x41f   :  { %v381_v41 = vmul.f32 2.0, %v1382_v61  ;;  %v386_v48 = vmul.f32 %v1382_v61, %v384_v47 }
 0x421   :  { %v1228_v42 = vadd.f32 -1.0, %v381_v41 }
 0x423   :  { %388 = vrot.lane.b32.xlu0 %v1228_v42, %s1456_s26 }
 0x495   :  { %v389_v45 = vpop.permute.xlu0 %388 }
 0x496   :  { %v391_v46 = vmul.f32 %v1382_v61, %v389_v45 }
 0x498   :  { %393 = vrot.lane.b32.xlu1 %v391_v46, %s1457_s27 }
 0x50a   :  { %v394_v49 = vpop.permute.xlu1 %393 }
 0x50b   :  { %v1619_v51 = vadd.f32 %v394_v49, %v386_v48 }
 0x50d   :  { %1383 = vtanh.f32 %v1619_v51 }
 0x517   :  { %v1384_v52 = vpop.eup %1383 }
 0x518   :  { %399 = vrot.lane.b32.xlu0 %v1384_v52, %s1460_s28 }
 0x58a   :  { %v400_v53 = vpop.permute.xlu0 %399 }
 0x58b   :  { %v402_v55 = vmul.f32 %v1382_v61, %v400_v53 }
 0x58d   :  { %416 = vperm.xlu0 %1323, %v402_v55   ;;  %405 = vperm.xlu1 %1322, %v402_v55  }
 0x591   :  { %1326 = vset.pattern.permute.xlu0 %v1461_v1  ;;  %1324 = vset.pattern.permute.xlu1 %v1462_v33 }
 0x592   :  { %449 = vperm.xlu0 %1326, %v402_v55   ;;  %427 = vperm.xlu1 %1324, %v402_v55  }
 0x596   :  { %1329 = vset.pattern.permute.xlu0 %v1463_v34  ;;  %1325 = vset.pattern.permute.xlu1 %v1464_v37 }
 0x597   :  { %482 = vperm.xlu0 %1329, %v402_v55   ;;  %438 = vperm.xlu1 %1325, %v402_v55  }
 0x59b   :  { %1327 = vset.pattern.permute.xlu1 %v1465_v38  ;;  %1331 = vset.pattern.permute.xlu0 %v1459_v29 }
 0x59c   :  { %460 = vperm.xlu1 %1327, %v402_v55  }
 0x5a0   :  { %1328 = vset.pattern.permute.xlu1 %v1466_v39 }
 0x5a1   :  { %471 = vperm.xlu1 %1328, %v402_v55  }
 0x5a5   :  { %1330 = vset.pattern.permute.xlu1 %v1458_v27 }
 0x60c   :  { %v417_v26 = vpop.permute.xlu0 %416  ;;  %v406_v56 = vpop.permute.xlu1 %405 }
 0x60d   :  { %v408_v57 = vmul.f32 %v406_v56, %v1532_v22  ;;  %v419_v58 = vmul.f32 %v417_v26, %v1538_v28 }
 0x60f   :  { %v410_v60 = vrot.slane %v408_v57, 4  ;;  %v421_v3 = vrot.slane %v419_v58, 4 }
 0x611   :  { %v450_v62 = vpop.permute.xlu0 %449  ;;  %411 = vrot.lane.b32.xlu1 %v410_v60, %s1455_s25  ;;  %v428_v63 = vpop.permute.xlu1 %427 }
 0x612   :  { %v430_v0 = vmul.f32 %v428_v63, %v1546_v35  ;;  %v452_v4 = vmul.f32 %v450_v62, %v1560_v44  ;;  %v501_v62 = vrot.slane %v1619_v51, 4 }
 0x614   :  { %v432_v5 = vrot.slane %v430_v0, 4  ;;  %v454_v8 = vrot.slane %v452_v4, 4 }
 0x615   :  { %422 = vrot.lane.b32.xlu1 %v421_v3, %s1455_s25 }
 0x616   :  { %433 = vrot.lane.b32.xlu0 %v432_v5, %s1455_s25  ;;  %v439_v6 = vpop.permute.xlu1 %438  ;;  %v483_v11 = vpop.permute.xlu0 %482 }
 0x617   :  { %v441_v7 = vmul.f32 %v439_v6, %v1550_v36  ;;  %v485_v14 = vmul.f32 %v483_v11, %v1572_v54 }
 0x619   :  { %v443_v9 = vrot.slane %v441_v7, 4  ;;  %v487_v18 = vrot.slane %v485_v14, 4 }
 0x61a   :  { %455 = vrot.lane.b32.xlu0 %v454_v8, %s1455_s25 }
 0x61b   :  { %444 = vrot.lane.b32.xlu1 %v443_v9, %s1455_s25  ;;  %v461_v12 = vpop.permute.xlu1 %460 }
 0x61c   :  { %v463_v13 = vmul.f32 %v461_v12, %v1556_v43 }
 0x61e   :  { %v465_v15 = vrot.slane %v463_v13, 4 }
 0x620   :  { %466 = vrot.lane.b32.xlu1 %v465_v15, %s1455_s25  ;;  %v472_v16 = vpop.permute.xlu1 %471 }
 0x621   :  { %v474_v17 = vmul.f32 %v472_v16, %v1566_v50 }
 0x623   :  { %v476_v19 = vrot.slane %v474_v17, 4 }
 0x624   :  { %488 = vrot.lane.b32.xlu1 %v487_v18, %s1455_s25 }
 0x625   :  { %477 = vrot.lane.b32.xlu0 %v476_v19, %s1455_s25 }
 0x683   :  { %v412_v20 = vpop.permute.xlu1 %411 }
 0x684   :  { %v414_v23 = vadd.f32 %v1577_v59, %v412_v20 }
 0x687   :  { %v423_v24 = vpop.permute.xlu1 %422 }
 0x688   :  { %v425_v25 = vadd.f32 %v423_v24, %v414_v23  ;;  %v434_v30 = vpop.permute.xlu0 %433 }
 0x68a   :  { %v436_v31 = vadd.f32 %v434_v30, %v425_v25 }
 0x68c   :  { %v456_v61 = vpop.permute.xlu0 %455 }
 0x68d   :  { %v445_v32 = vpop.permute.xlu1 %444 }
 0x68e   :  { %v447_v40 = vadd.f32 %v445_v32, %v436_v31 }
 0x690   :  { %v458_v41 = vadd.f32 %v456_v61, %v447_v40 }
 0x692   :  { %v467_v42 = vpop.permute.xlu1 %466 }
 0x693   :  { %v469_v45 = vadd.f32 %v467_v42, %v458_v41  ;;  %v21_v42 = vld [vmem:[%s1847_s0 + $0x10] sm:$0xff] }
 0x696   :  { %v489_v48 = vpop.permute.xlu1 %488 }
 0x697   :  { %v478_v46 = vpop.permute.xlu0 %477 }
 0x698   :  { %v480_v47 = vadd.f32 %v478_v46, %v469_v45 }
 0x69a   :  { %v491_v49 = vadd.f32 %v489_v48, %v480_v47 }
 0x69c   :  { %v1229_v52 = vmul.f32 -1.442695, %v491_v49 }
 0x69e   :  { %1385 = vpow2.f32 %v1229_v52 }
 0x6a8   :  { %v1386_v53 = vpop.eup %1385 }
 0x6a9   :  { %v495_v55 = vadd.f32 1.0, %v1386_v53 }
 0x6ab   :  { %1387 = vrcp.f32 %v495_v55 }
 0x6b5   :  { %v1388_v26 = vpop.eup %1387 }
 0x6b6   :  { %v498_v56 = vmul.f32 2.0, %v1388_v26  ;;  %v503_v63 = vmul.f32 %v1388_v26, %v501_v62 }
 0x6b8   :  { %v1230_v57 = vadd.f32 -1.0, %v498_v56 }
 0x6ba   :  { %505 = vrot.lane.b32.xlu0 %v1230_v57, %s1456_s26 }
 0x72c   :  { %v506_v58 = vpop.permute.xlu0 %505 }
 0x72d   :  { %v508_v60 = vmul.f32 %v1388_v26, %v506_v58 }
 0x72f   :  { %510 = vrot.lane.b32.xlu1 %v508_v60, %s1457_s27 }
 0x7a1   :  { %v511_v0 = vpop.permute.xlu1 %510 }
 0x7a2   :  { %v1651_v3 = vadd.f32 %v511_v0, %v503_v63 }
 0x7a4   :  { %1389 = vtanh.f32 %v1651_v3 }
 0x7ae   :  { %v1390_v4 = vpop.eup %1389 }
 0x7af   :  { %516 = vrot.lane.b32.xlu0 %v1390_v4, %s1460_s28 }
 0x821   :  { %v517_v5 = vpop.permute.xlu0 %516 }
 0x822   :  { %v519_v6 = vmul.f32 %v1388_v26, %v517_v5 }
 0x824   :  { %533 = vperm.xlu0 %1331, %v519_v6   ;;  %522 = vperm.xlu1 %1330, %v519_v6  }
 0x828   :  { %1334 = vset.pattern.permute.xlu0 %v1461_v1  ;;  %1332 = vset.pattern.permute.xlu1 %v1462_v33 }
 0x829   :  { %566 = vperm.xlu0 %1334, %v519_v6   ;;  %544 = vperm.xlu1 %1332, %v519_v6  }
 0x82d   :  { %1337 = vset.pattern.permute.xlu0 %v1463_v34  ;;  %1333 = vset.pattern.permute.xlu1 %v1464_v37 }
 0x82e   :  { %599 = vperm.xlu0 %1337, %v519_v6   ;;  %555 = vperm.xlu1 %1333, %v519_v6  }
 0x832   :  { %1335 = vset.pattern.permute.xlu1 %v1465_v38  ;;  %1339 = vset.pattern.permute.xlu0 %v1446_v2 }
 0x833   :  { %577 = vperm.xlu1 %1335, %v519_v6  }
 0x837   :  { %1336 = vset.pattern.permute.xlu1 %v1466_v39 }
 0x838   :  { %588 = vperm.xlu1 %1336, %v519_v6  }
 0x83c   :  { %1338 = vset.pattern.permute.xlu1 %v1446_v2 }
 0x8a3   :  { %v534_v51 = vpop.permute.xlu0 %533  ;;  %v523_v7 = vpop.permute.xlu1 %522 }
 0x8a4   :  { %v525_v8 = vmul.f32 %v523_v7, %v1532_v22  ;;  %v536_v9 = vmul.f32 %v534_v51, %v1538_v28 }
 0x8a6   :  { %v527_v11 = vrot.slane %v525_v8, 4  ;;  %v538_v15 = vrot.slane %v536_v9, 4 }
 0x8a8   :  { %v567_v12 = vpop.permute.xlu0 %566  ;;  %528 = vrot.lane.b32.xlu1 %v527_v11, %s1455_s25  ;;  %v545_v13 = vpop.permute.xlu1 %544 }
 0x8a9   :  { %v547_v14 = vmul.f32 %v545_v13, %v1546_v35  ;;  %v569_v16 = vmul.f32 %v567_v12, %v1560_v44  ;;  %v22_v13 = vld [vmem:[%s1847_s0 + $0x18] sm:$0xff] }
 0x8ab   :  { %v549_v17 = vrot.slane %v547_v14, 4  ;;  %v571_v19 = vrot.slane %v569_v16, 4  ;;  %v618_v14 = vrot.slane %v1651_v3, 4 }
 0x8ac   :  { %539 = vrot.lane.b32.xlu1 %v538_v15, %s1455_s25 }
 0x8ad   :  { %550 = vrot.lane.b32.xlu0 %v549_v17, %s1455_s25  ;;  %v556_v2 = vpop.permute.xlu1 %555  ;;  %v600_v23 = vpop.permute.xlu0 %599 }
 0x8ae   :  { %v558_v18 = vmul.f32 %v556_v2, %v1550_v36  ;;  %v602_v30 = vmul.f32 %v600_v23, %v1572_v54 }
 0x8b0   :  { %v560_v20 = vrot.slane %v558_v18, 4  ;;  %v604_v61 = vrot.slane %v602_v30, 4 }
 0x8b1   :  { %572 = vrot.lane.b32.xlu0 %v571_v19, %s1455_s25 }
 0x8b2   :  { %561 = vrot.lane.b32.xlu1 %v560_v20, %s1455_s25  ;;  %v578_v24 = vpop.permute.xlu1 %577 }
 0x8b3   :  { %v580_v25 = vmul.f32 %v578_v24, %v1556_v43 }
 0x8b5   :  { %v582_v31 = vrot.slane %v580_v25, 4 }
 0x8b7   :  { %583 = vrot.lane.b32.xlu1 %v582_v31, %s1455_s25  ;;  %v589_v32 = vpop.permute.xlu1 %588 }
 0x8b8   :  { %v591_v40 = vmul.f32 %v589_v32, %v1566_v50 }
 0x8ba   :  { %v593_v41 = vrot.slane %v591_v40, 4 }
 0x8bb   :  { %605 = vrot.lane.b32.xlu1 %v604_v61, %s1455_s25 }
 0x8bc   :  { %594 = vrot.lane.b32.xlu0 %v593_v41, %s1455_s25 }
 0x8bf   :  { %32 = vperm.xlu1 %1338, %v21_v42  }
 0x8c3   :  { %1341 = vset.pattern.permute.xlu1 %v1459_v29 }
 0x91a   :  { %v529_v45 = vpop.permute.xlu1 %528 }
 0x91b   :  { %v531_v46 = vadd.f32 %v1577_v59, %v529_v45 }
 0x91e   :  { %v540_v47 = vpop.permute.xlu1 %539 }
 0x91f   :  { %v542_v48 = vadd.f32 %v540_v47, %v531_v46  ;;  %v551_v49 = vpop.permute.xlu0 %550 }
 0x921   :  { %v553_v52 = vadd.f32 %v551_v49, %v542_v48 }
 0x923   :  { %v573_v26 = vpop.permute.xlu0 %572 }
 0x924   :  { %v562_v53 = vpop.permute.xlu1 %561 }
 0x925   :  { %v564_v55 = vadd.f32 %v562_v53, %v553_v52 }
 0x927   :  { %v575_v56 = vadd.f32 %v573_v26, %v564_v55 }
 0x929   :  { %v584_v57 = vpop.permute.xlu1 %583 }
 0x92a   :  { %v586_v58 = vadd.f32 %v584_v57, %v575_v56 }
 0x92d   :  { %v606_v63 = vpop.permute.xlu1 %605 }
 0x92e   :  { %v595_v60 = vpop.permute.xlu0 %594 }
 0x92f   :  { %v597_v62 = vadd.f32 %v595_v60, %v586_v58 }
 0x931   :  { %v608_v0 = vadd.f32 %v606_v63, %v597_v62 }
 0x933   :  { %v1231_v4 = vmul.f32 -1.442695, %v608_v0 }
 0x935   :  { %1391 = vpow2.f32 %v1231_v4 }
 0x93e   :  { %v33_v8 = vpop.permute.xlu1 %32 }
 0x93f   :  { %v1392_v5 = vpop.eup %1391  ;;  %vm39_vm3 = vcmp.eq.s32.totalorder %v33_v8, %v1529_v21 }
 0x940   :  { %v612_v6 = vadd.f32 1.0, %v1392_v5  ;;  %v1219_v9 = vsel %vm39_vm3, 1.0, %v1447_v10 }
 0x941   :  { %1263 = vmatprep.mubr.msk.f32.mxu0 %vm49_vm0, %v1219_v9 }
 0x942   :  { %1393 = vrcp.f32 %v612_v6 }
 0x94c   :  { %v1394_v59 = vpop.eup %1393 }
 0x94d   :  { %v615_v51 = vmul.f32 2.0, %v1394_v59  ;;  %v620_v15 = vmul.f32 %v1394_v59, %v618_v14 }
 0x94f   :  { %v1232_v7 = vadd.f32 -1.0, %v615_v51 }
 0x951   :  { %622 = vrot.lane.b32.xlu0 %v1232_v7, %s1456_s26 }
 0x955   :  { %35 = vperm.xlu0 %1339, %v22_v13  }
 0x959   :  { %1340 = vset.pattern.permute.xlu0 %v1458_v27 }
 0x9c3   :  { %v623_v11 = vpop.permute.xlu0 %622 }
 0x9c4   :  { %v625_v12 = vmul.f32 %v1394_v59, %v623_v11 }
 0x9c6   :  { %627 = vrot.lane.b32.xlu1 %v625_v12, %s1457_s27 }
 0x9d4   :  { %v36_v18 = vpop.permute.xlu0 %35 }
 0x9d5   :  { %vm40_vm4 = vcmp.eq.s32.totalorder %v36_v18, %v1529_v21 }
 0x9d6   :  { %v1220_v19 = vsel %vm40_vm4, 1.0, %v1447_v10 }
 0x9d7   :  { %1264 = vmatmul.mubr.msk.f32.gmra.mrb[2].mxu0 %vm49_vm0, %v1220_v19 }
 0xa38   :  { %v628_v16 = vpop.permute.xlu1 %627 }
 0xa39   :  { %v1694_v17 = vadd.f32 %v628_v16, %v620_v15 }
 0xa3b   :  { %1395 = vtanh.f32 %v1694_v17 }
 0xa45   :  { %v1396_v2 = vpop.eup %1395 }
 0xa46   :  { %633 = vrot.lane.b32.xlu1 %v1396_v2, %s1460_s28 }
 0xaaa   :  { %v1709_v21 = vpop.f32.mrb[2].mxu0 }
 0xaab   :  { %v1711_v3 = vpop.f32.mrb[3].mxu0 }
 0xab8   :  { %v634_v20 = vpop.permute.xlu1 %633 }
 0xab9   :  { %v636_v23 = vmul.f32 %v1394_v59, %v634_v20 }
 0xabb   :  { %650 = vperm.xlu1 %1341, %v636_v23   ;;  %639 = vperm.xlu0 %1340, %v636_v23  }
 0xabf   :  { %1342 = vset.pattern.permute.xlu1 %v1462_v33  ;;  %1343 = vset.pattern.permute.xlu0 %v1464_v37 }
 0xac0   :  { %661 = vperm.xlu1 %1342, %v636_v23   ;;  %672 = vperm.xlu0 %1343, %v636_v23  }
 0xac4   :  { %1344 = vset.pattern.permute.xlu1 %v1461_v1  ;;  %1346 = vset.pattern.permute.xlu0 %v1466_v39 }
 0xac5   :  { %683 = vperm.xlu1 %1344, %v636_v23   ;;  %705 = vperm.xlu0 %1346, %v636_v23  }
 0xac9   :  { %1345 = vset.pattern.permute.xlu1 %v1465_v38  ;;  %1348 = vset.pattern.permute.xlu0 %v1458_v27 }
 0xaca   :  { %694 = vperm.xlu1 %1345, %v636_v23  }
 0xace   :  { %1347 = vset.pattern.permute.xlu1 %v1463_v34 }
 0xacf   :  { %716 = vperm.xlu1 %1347, %v636_v23  }
 0xad3   :  { %1349 = vset.pattern.permute.xlu1 %v1459_v29 }
 0xb3a   :  { %v651_v24 = vpop.permute.xlu1 %650  ;;  %v640_v25 = vpop.permute.xlu0 %639 }
 0xb3b   :  { %v653_v30 = vmul.f32 %v651_v24, %v1538_v28  ;;  %v642_v31 = vmul.f32 %v640_v25, %v1532_v22 }
 0xb3d   :  { %v655_v32 = vrot.slane %v653_v30, 4  ;;  %v644_v40 = vrot.slane %v642_v31, 4 }
 0xb3f   :  { %v662_v61 = vpop.permute.xlu1 %661  ;;  %656 = vrot.lane.b32.xlu0 %v655_v32, %s1455_s25  ;;  %645 = vrot.lane.b32.xlu1 %v644_v40, %s1455_s25  ;;  %v673_v41 = vpop.permute.xlu0 %672  ;;  %v735_v32 = vrot.slane %v1694_v17, 4 }
 0xb40   :  { %v664_v42 = vmul.f32 %v662_v61, %v1546_v35  ;;  %v675_v45 = vmul.f32 %v673_v41, %v1550_v36 }
 0xb42   :  { %v666_v46 = vrot.slane %v664_v42, 4  ;;  %v677_v47 = vrot.slane %v675_v45, 4 }
 0xb44   :  { %v684_v48 = vpop.permute.xlu1 %683  ;;  %667 = vrot.lane.b32.xlu1 %v666_v46, %s1455_s25  ;;  %678 = vrot.lane.b32.xlu0 %v677_v47, %s1455_s25  ;;  %v706_v49 = vpop.permute.xlu0 %705 }
 0xb45   :  { %v686_v52 = vmul.f32 %v684_v48, %v1560_v44  ;;  %v708_v55 = vmul.f32 %v706_v49, %v1566_v50 }
 0xb47   :  { %v688_v53 = vrot.slane %v686_v52, 4  ;;  %v710_v57 = vrot.slane %v708_v55, 4 }
 0xb49   :  { %v695_v26 = vpop.permute.xlu1 %694  ;;  %689 = vrot.lane.b32.xlu1 %v688_v53, %s1455_s25 }
 0xb4a   :  { %v697_v56 = vmul.f32 %v695_v26, %v1556_v43 }
 0xb4c   :  { %v699_v58 = vrot.slane %v697_v56, 4 }
 0xb4d   :  { %711 = vrot.lane.b32.xlu1 %v710_v57, %s1455_s25 }
 0xb4e   :  { %v717_v60 = vpop.permute.xlu1 %716  ;;  %700 = vrot.lane.b32.xlu0 %v699_v58, %s1455_s25 }
 0xb4f   :  { %v719_v62 = vmul.f32 %v717_v60, %v1572_v54 }
 0xb51   :  { %v721_v63 = vrot.slane %v719_v62, 4 }
 0xb53   :  { %722 = vrot.lane.b32.xlu0 %v721_v63, %s1455_s25 }
 0xbb1   :  { %v646_v0 = vpop.permute.xlu1 %645  ;;  %v657_v5 = vpop.permute.xlu0 %656 }
 0xbb2   :  { %v648_v4 = vadd.f32 %v646_v0, %v1711_v3 }
 0xbb4   :  { %v659_v6 = vadd.f32 %v657_v5, %v648_v4 }
 0xbb6   :  { %v668_v59 = vpop.permute.xlu1 %667  ;;  %v679_v7 = vpop.permute.xlu0 %678 }
 0xbb7   :  { %v670_v51 = vadd.f32 %v668_v59, %v659_v6 }
 0xbb9   :  { %v681_v8 = vadd.f32 %v679_v7, %v670_v51 }
 0xbbb   :  { %v690_v9 = vpop.permute.xlu1 %689 }
 0xbbc   :  { %v692_v11 = vadd.f32 %v690_v9, %v681_v8 }
 0xbbf   :  { %v712_v14 = vpop.permute.xlu1 %711 }
 0xbc0   :  { %v701_v12 = vpop.permute.xlu0 %700 }
 0xbc1   :  { %v703_v13 = vadd.f32 %v701_v12, %v692_v11 }
 0xbc3   :  { %v714_v15 = vadd.f32 %v712_v14, %v703_v13 }
 0xbc5   :  { %v723_v16 = vpop.permute.xlu0 %722 }
 0xbc6   :  { %v725_v2 = vadd.f32 %v723_v16, %v714_v15 }
 0xbc8   :  { %v1233_v18 = vmul.f32 -1.442695, %v725_v2 }
 0xbca   :  { %1397 = vpow2.f32 %v1233_v18 }
 0xbd4   :  { %v1398_v19 = vpop.eup %1397 }
 0xbd5   :  { %v729_v20 = vadd.f32 1.0, %v1398_v19 }
 0xbd7   :  { %1399 = vrcp.f32 %v729_v20 }
 0xbe1   :  { %v1400_v23 = vpop.eup %1399 }
 0xbe2   :  { %v732_v24 = vmul.f32 2.0, %v1400_v23  ;;  %v737_v40 = vmul.f32 %v1400_v23, %v735_v32 }
 0xbe4   :  { %v1234_v25 = vadd.f32 -1.0, %v732_v24 }
 0xbe6   :  { %739 = vrot.lane.b32.xlu1 %v1234_v25, %s1456_s26 }
 0xc58   :  { %v740_v30 = vpop.permute.xlu1 %739 }
 0xc59   :  { %v742_v31 = vmul.f32 %v1400_v23, %v740_v30 }
 0xc5b   :  { %744 = vrot.lane.b32.xlu0 %v742_v31, %s1457_s27 }
 0xccd   :  { %v745_v61 = vpop.permute.xlu0 %744 }
 0xcce   :  { %v1733_v41 = vadd.f32 %v745_v61, %v737_v40 }
 0xcd0   :  { %1401 = vtanh.f32 %v1733_v41 }
 0xcda   :  { %v1402_v42 = vpop.eup %1401 }
 0xcdb   :  { %750 = vrot.lane.b32.xlu1 %v1402_v42, %s1460_s28 }
 0xd4d   :  { %v751_v45 = vpop.permute.xlu1 %750 }
 0xd4e   :  { %v753_v46 = vmul.f32 %v1400_v23, %v751_v45 }
 0xd50   :  { %767 = vperm.xlu1 %1349, %v753_v46   ;;  %756 = vperm.xlu0 %1348, %v753_v46  }
 0xd54   :  { %1350 = vset.pattern.permute.xlu1 %v1462_v33  ;;  %1351 = vset.pattern.permute.xlu0 %v1464_v37 }
 0xd55   :  { %778 = vperm.xlu1 %1350, %v753_v46   ;;  %789 = vperm.xlu0 %1351, %v753_v46  }
 0xd59   :  { %1352 = vset.pattern.permute.xlu1 %v1461_v1  ;;  %1354 = vset.pattern.permute.xlu0 %v1466_v39 }
 0xd5a   :  { %800 = vperm.xlu1 %1352, %v753_v46   ;;  %822 = vperm.xlu0 %1354, %v753_v46  }
 0xd5e   :  { %1353 = vset.pattern.permute.xlu1 %v1465_v38  ;;  %1356 = vset.pattern.permute.xlu0 %v1458_v27 }
 0xd5f   :  { %811 = vperm.xlu1 %1353, %v753_v46  }
 0xd63   :  { %1355 = vset.pattern.permute.xlu1 %v1463_v34 }
 0xd64   :  { %833 = vperm.xlu1 %1355, %v753_v46  }
 0xd68   :  { %1357 = vset.pattern.permute.xlu1 %v1459_v29 }
 0xdcf   :  { %v768_v17 = vpop.permute.xlu1 %767  ;;  %v757_v47 = vpop.permute.xlu0 %756 }
 0xdd0   :  { %v770_v48 = vmul.f32 %v768_v17, %v1538_v28  ;;  %v759_v49 = vmul.f32 %v757_v47, %v1532_v22 }
 0xdd2   :  { %v772_v52 = vrot.slane %v770_v48, 4  ;;  %v761_v53 = vrot.slane %v759_v49, 4  ;;  %v852_v49 = vrot.slane %v1733_v41, 4 }
 0xdd4   :  { %v779_v55 = vpop.permute.xlu1 %778  ;;  %773 = vrot.lane.b32.xlu0 %v772_v52, %s1455_s25  ;;  %762 = vrot.lane.b32.xlu1 %v761_v53, %s1455_s25  ;;  %v790_v26 = vpop.permute.xlu0 %789 }
 0xdd5   :  { %v781_v56 = vmul.f32 %v779_v55, %v1546_v35  ;;  %v792_v57 = vmul.f32 %v790_v26, %v1550_v36 }
 0xdd7   :  { %v783_v58 = vrot.slane %v781_v56, 4  ;;  %v794_v60 = vrot.slane %v792_v57, 4 }
 0xdd9   :  { %v801_v62 = vpop.permute.xlu1 %800  ;;  %784 = vrot.lane.b32.xlu1 %v783_v58, %s1455_s25  ;;  %795 = vrot.lane.b32.xlu0 %v794_v60, %s1455_s25  ;;  %v823_v63 = vpop.permute.xlu0 %822 }
 0xdda   :  { %v803_v0 = vmul.f32 %v801_v62, %v1560_v44  ;;  %v825_v5 = vmul.f32 %v823_v63, %v1566_v50 }
 0xddc   :  { %v805_v4 = vrot.slane %v803_v0, 4  ;;  %v827_v51 = vrot.slane %v825_v5, 4 }
 0xdde   :  { %v812_v6 = vpop.permute.xlu1 %811  ;;  %806 = vrot.lane.b32.xlu1 %v805_v4, %s1455_s25 }
 0xddf   :  { %v814_v59 = vmul.f32 %v812_v6, %v1556_v43 }
 0xde1   :  { %v816_v7 = vrot.slane %v814_v59, 4 }
 0xde2   :  { %828 = vrot.lane.b32.xlu1 %v827_v51, %s1455_s25 }
 0xde3   :  { %v834_v8 = vpop.permute.xlu1 %833  ;;  %817 = vrot.lane.b32.xlu0 %v816_v7, %s1455_s25 }
 0xde4   :  { %v836_v9 = vmul.f32 %v834_v8, %v1572_v54 }
 0xde6   :  { %v838_v11 = vrot.slane %v836_v9, 4 }
 0xde8   :  { %839 = vrot.lane.b32.xlu0 %v838_v11, %s1455_s25 }
 0xe46   :  { %v763_v12 = vpop.permute.xlu1 %762  ;;  %v774_v14 = vpop.permute.xlu0 %773 }
 0xe47   :  { %v765_v13 = vadd.f32 %v763_v12, %v1711_v3 }
 0xe49   :  { %v776_v15 = vadd.f32 %v774_v14, %v765_v13 }
 0xe4b   :  { %v785_v16 = vpop.permute.xlu1 %784  ;;  %v796_v18 = vpop.permute.xlu0 %795 }
 0xe4c   :  { %v787_v2 = vadd.f32 %v785_v16, %v776_v15 }
 0xe4e   :  { %v798_v19 = vadd.f32 %v796_v18, %v787_v2 }
 0xe50   :  { %v807_v20 = vpop.permute.xlu1 %806 }
 0xe51   :  { %v809_v23 = vadd.f32 %v807_v20, %v798_v19 }
 0xe54   :  { %v829_v30 = vpop.permute.xlu1 %828 }
 0xe55   :  { %v818_v24 = vpop.permute.xlu0 %817 }
 0xe56   :  { %v820_v25 = vadd.f32 %v818_v24, %v809_v23 }
 0xe58   :  { %v831_v31 = vadd.f32 %v829_v30, %v820_v25 }
 0xe5a   :  { %v840_v32 = vpop.permute.xlu0 %839 }
 0xe5b   :  { %v842_v40 = vadd.f32 %v840_v32, %v831_v31 }
 0xe5d   :  { %v1235_v61 = vmul.f32 -1.442695, %v842_v40 }
 0xe5f   :  { %1403 = vpow2.f32 %v1235_v61 }
 0xe69   :  { %v1404_v42 = vpop.eup %1403 }
 0xe6a   :  { %v846_v45 = vadd.f32 1.0, %v1404_v42 }
 0xe6c   :  { %1405 = vrcp.f32 %v846_v45 }
 0xe76   :  { %v1406_v3 = vpop.eup %1405 }
 0xe77   :  { %v849_v46 = vmul.f32 2.0, %v1406_v3  ;;  %v854_v52 = vmul.f32 %v1406_v3, %v852_v49 }
 0xe79   :  { %v1236_v17 = vadd.f32 -1.0, %v849_v46 }
 0xe7b   :  { %856 = vrot.lane.b32.xlu1 %v1236_v17, %s1456_s26 }
 0xeed   :  { %v857_v47 = vpop.permute.xlu1 %856 }
 0xeee   :  { %v859_v48 = vmul.f32 %v1406_v3, %v857_v47 }
 0xef0   :  { %861 = vrot.lane.b32.xlu0 %v859_v48, %s1457_s27 }
 0xf62   :  { %v862_v53 = vpop.permute.xlu0 %861 }
 0xf63   :  { %v1765_v55 = vadd.f32 %v862_v53, %v854_v52 }
 0xf65   :  { %1407 = vtanh.f32 %v1765_v55 }
 0xf6f   :  { %v1408_v26 = vpop.eup %1407 }
 0xf70   :  { %867 = vrot.lane.b32.xlu1 %v1408_v26, %s1460_s28 }
 0xfe2   :  { %v868_v56 = vpop.permute.xlu1 %867 }
 0xfe3   :  { %v870_v57 = vmul.f32 %v1406_v3, %v868_v56 }
 0xfe5   :  { %884 = vperm.xlu1 %1357, %v870_v57   ;;  %873 = vperm.xlu0 %1356, %v870_v57  }
 0xfe9   :  { %1358 = vset.pattern.permute.xlu1 %v1462_v33  ;;  %1359 = vset.pattern.permute.xlu0 %v1464_v37 }
 0xfea   :  { %895 = vperm.xlu1 %1358, %v870_v57   ;;  %906 = vperm.xlu0 %1359, %v870_v57  }
 0xfee   :  { %1360 = vset.pattern.permute.xlu1 %v1461_v1  ;;  %1362 = vset.pattern.permute.xlu0 %v1466_v39 }
 0xfef   :  { %917 = vperm.xlu1 %1360, %v870_v57   ;;  %939 = vperm.xlu0 %1362, %v870_v57  }
 0xff3   :  { %1361 = vset.pattern.permute.xlu1 %v1465_v38  ;;  %1364 = vset.pattern.permute.xlu0 %v1458_v27 }
 0xff4   :  { %928 = vperm.xlu1 %1361, %v870_v57  }
 0xff8   :  { %1363 = vset.pattern.permute.xlu1 %v1463_v34 }
 0xff9   :  { %950 = vperm.xlu1 %1363, %v870_v57  }
 0xffd   :  { %1365 = vset.pattern.permute.xlu1 %v1459_v29 }
0x1064   :  { %v885_v41 = vpop.permute.xlu1 %884  ;;  %v874_v58 = vpop.permute.xlu0 %873 }
0x1065   :  { %v887_v60 = vmul.f32 %v885_v41, %v1538_v28  ;;  %v876_v62 = vmul.f32 %v874_v58, %v1532_v22  ;;  %v969_v58 = vrot.slane %v1765_v55, 4 }
0x1067   :  { %v889_v63 = vrot.slane %v887_v60, 4  ;;  %v878_v0 = vrot.slane %v876_v62, 4 }
0x1069   :  { %v896_v4 = vpop.permute.xlu1 %895  ;;  %890 = vrot.lane.b32.xlu0 %v889_v63, %s1455_s25  ;;  %879 = vrot.lane.b32.xlu1 %v878_v0, %s1455_s25  ;;  %v907_v27 = vpop.permute.xlu0 %906 }
0x106a   :  { %v898_v5 = vmul.f32 %v896_v4, %v1546_v35  ;;  %v909_v6 = vmul.f32 %v907_v27, %v1550_v36 }
0x106c   :  { %v900_v59 = vrot.slane %v898_v5, 4  ;;  %v911_v29 = vrot.slane %v909_v6, 4 }
0x106e   :  { %v918_v51 = vpop.permute.xlu1 %917  ;;  %901 = vrot.lane.b32.xlu1 %v900_v59, %s1455_s25  ;;  %912 = vrot.lane.b32.xlu0 %v911_v29, %s1455_s25  ;;  %v940_v7 = vpop.permute.xlu0 %939 }
0x106f   :  { %v920_v8 = vmul.f32 %v918_v51, %v1560_v44  ;;  %v942_v11 = vmul.f32 %v940_v7, %v1566_v50 }
0x1071   :  { %v922_v9 = vrot.slane %v920_v8, 4  ;;  %v944_v14 = vrot.slane %v942_v11, 4 }
0x1073   :  { %v929_v12 = vpop.permute.xlu1 %928  ;;  %923 = vrot.lane.b32.xlu1 %v922_v9, %s1455_s25 }
0x1074   :  { %v931_v13 = vmul.f32 %v929_v12, %v1556_v43 }
0x1076   :  { %v933_v15 = vrot.slane %v931_v13, 4 }
0x1077   :  { %945 = vrot.lane.b32.xlu1 %v944_v14, %s1455_s25 }
0x1078   :  { %v951_v16 = vpop.permute.xlu1 %950  ;;  %934 = vrot.lane.b32.xlu0 %v933_v15, %s1455_s25 }
0x1079   :  { %v953_v2 = vmul.f32 %v951_v16, %v1572_v54 }
0x107b   :  { %v955_v18 = vrot.slane %v953_v2, 4 }
0x107d   :  { %956 = vrot.lane.b32.xlu0 %v955_v18, %s1455_s25 }
0x10db   :  { %v880_v19 = vpop.permute.xlu1 %879  ;;  %v891_v23 = vpop.permute.xlu0 %890 }
0x10dc   :  { %v882_v20 = vadd.f32 %v1709_v21, %v880_v19 }
0x10de   :  { %v893_v24 = vadd.f32 %v891_v23, %v882_v20 }
0x10e0   :  { %v902_v25 = vpop.permute.xlu1 %901  ;;  %v913_v31 = vpop.permute.xlu0 %912 }
0x10e1   :  { %v904_v30 = vadd.f32 %v902_v25, %v893_v24 }
0x10e3   :  { %v915_v32 = vadd.f32 %v913_v31, %v904_v30 }
0x10e5   :  { %v924_v40 = vpop.permute.xlu1 %923 }
0x10e6   :  { %v926_v61 = vadd.f32 %v924_v40, %v915_v32 }
0x10e9   :  { %v946_v3 = vpop.permute.xlu1 %945 }
0x10ea   :  { %v935_v42 = vpop.permute.xlu0 %934 }
0x10eb   :  { %v937_v45 = vadd.f32 %v935_v42, %v926_v61 }
0x10ed   :  { %v948_v46 = vadd.f32 %v946_v3, %v937_v45 }
0x10ef   :  { %v957_v17 = vpop.permute.xlu0 %956 }
0x10f0   :  { %v959_v47 = vadd.f32 %v957_v17, %v948_v46 }
0x10f2   :  { %v1237_v48 = vmul.f32 -1.442695, %v959_v47 }
0x10f4   :  { %1409 = vpow2.f32 %v1237_v48 }
0x10fe   :  { %v1410_v49 = vpop.eup %1409 }
0x10ff   :  { %v963_v52 = vadd.f32 1.0, %v1410_v49  ;;  %v1421_v49 = vld [vmem:[%s1848_s1] sm:$0xff]  ;;  %s1470_s1 = smov 104  }
0x1101   :  { %1411 = vrcp.f32 %v963_v52 }
0x110b   :  { %v1412_v53 = vpop.eup %1411 }
0x110c   :  { %v966_v26 = vmul.f32 2.0, %v1412_v53  ;;  %v971_v60 = vmul.f32 %v1412_v53, %v969_v58 }
0x110e   :  { %v1238_v56 = vadd.f32 -1.0, %v966_v26 }
0x1110   :  { %973 = vrot.lane.b32.xlu1 %v1238_v56, %s1456_s26 }
0x1182   :  { %v974_v57 = vpop.permute.xlu1 %973 }
0x1183   :  { %v976_v41 = vmul.f32 %v1412_v53, %v974_v57 }
0x1185   :  { %978 = vrot.lane.b32.xlu0 %v976_v41, %s1457_s27 }
0x11f7   :  { %v979_v62 = vpop.permute.xlu0 %978 }
0x11f8   :  { %v1797_v63 = vadd.f32 %v979_v62, %v971_v60 }
0x11fa   :  { %1413 = vtanh.f32 %v1797_v63  ;;  %v1086_v52 = vrot.slane %v1797_v63, 4 }
0x1204   :  { %v1414_v0 = vpop.eup %1413 }
0x1205   :  { %984 = vrot.lane.b32.xlu1 %v1414_v0, %s1460_s28 }
0x1277   :  { %v985_v4 = vpop.permute.xlu1 %984 }
0x1278   :  { %v987_v27 = vmul.f32 %v1412_v53, %v985_v4 }
0x127a   :  { %1001 = vperm.xlu1 %1365, %v987_v27   ;;  %990 = vperm.xlu0 %1364, %v987_v27  }
0x127e   :  { %1366 = vset.pattern.permute.xlu1 %v1462_v33  ;;  %1367 = vset.pattern.permute.xlu0 %v1464_v37 }
0x127f   :  { %1012 = vperm.xlu1 %1366, %v987_v27   ;;  %1023 = vperm.xlu0 %1367, %v987_v27  }
0x1283   :  { %1368 = vset.pattern.permute.xlu1 %v1461_v1  ;;  %1370 = vset.pattern.permute.xlu0 %v1466_v39 }
0x1284   :  { %1034 = vperm.xlu1 %1368, %v987_v27   ;;  %1056 = vperm.xlu0 %1370, %v987_v27  }
0x1288   :  { %1369 = vset.pattern.permute.xlu1 %v1465_v38  ;;  %1372 = vset.pattern.permute.xlu0 %v1463_v34 }
0x1289   :  { %1045 = vperm.xlu1 %1369, %v987_v27  }
0x128d   :  { %1371 = vset.pattern.permute.xlu1 %v1463_v34 }
0x128e   :  { %1067 = vperm.xlu1 %1371, %v987_v27  }
0x12f9   :  { %v1002_v55 = vpop.permute.xlu1 %1001  ;;  %v991_v33 = vpop.permute.xlu0 %990 }
0x12fa   :  { %v1004_v37 = vmul.f32 %v1002_v55, %v1538_v28  ;;  %v993_v5 = vmul.f32 %v991_v33, %v1532_v22 }
0x12fc   :  { %v1006_v6 = vrot.slane %v1004_v37, 4  ;;  %v995_v1 = vrot.slane %v993_v5, 4 }
0x12fe   :  { %v1013_v59 = vpop.permute.xlu1 %1012  ;;  %1007 = vrot.lane.b32.xlu0 %v1006_v6, %s1455_s25  ;;  %996 = vrot.lane.b32.xlu1 %v995_v1, %s1455_s25  ;;  %v1024_v38 = vpop.permute.xlu0 %1023 }
0x12ff   :  { %v1015_v39 = vmul.f32 %v1013_v59, %v1546_v35  ;;  %v1026_v29 = vmul.f32 %v1024_v38, %v1550_v36 }
0x1301   :  { %v1017_v34 = vrot.slane %v1015_v39, 4  ;;  %v1028_v51 = vrot.slane %v1026_v29, 4 }
0x1303   :  { %v1035_v7 = vpop.permute.xlu1 %1034  ;;  %1018 = vrot.lane.b32.xlu1 %v1017_v34, %s1455_s25  ;;  %1029 = vrot.lane.b32.xlu0 %v1028_v51, %s1455_s25  ;;  %v1057_v28 = vpop.permute.xlu0 %1056 }
0x1304   :  { %v1037_v8 = vmul.f32 %v1035_v7, %v1560_v44  ;;  %v1059_v11 = vmul.f32 %v1057_v28, %v1566_v50 }
0x1306   :  { %v1039_v9 = vrot.slane %v1037_v8, 4  ;;  %v1061_v13 = vrot.slane %v1059_v11, 4 }
0x1308   :  { %v1046_v12 = vpop.permute.xlu1 %1045  ;;  %1040 = vrot.lane.b32.xlu1 %v1039_v9, %s1455_s25 }
0x1309   :  { %v1048_v35 = vmul.f32 %v1046_v12, %v1556_v43 }
0x130b   :  { %v1050_v36 = vrot.slane %v1048_v35, 4 }
0x130c   :  { %1062 = vrot.lane.b32.xlu1 %v1061_v13, %s1455_s25 }
0x130d   :  { %v1068_v14 = vpop.permute.xlu1 %1067  ;;  %1051 = vrot.lane.b32.xlu0 %v1050_v36, %s1455_s25 }
0x130e   :  { %v1070_v15 = vmul.f32 %v1068_v14, %v1572_v54 }
0x1310   :  { %v1072_v16 = vrot.slane %v1070_v15, 4 }
0x1312   :  { %1073 = vrot.lane.b32.xlu0 %v1072_v16, %s1455_s25 }
0x1370   :  { %v997_v44 = vpop.permute.xlu1 %996  ;;  %v1008_v2 = vpop.permute.xlu0 %1007 }
0x1371   :  { %v999_v50 = vadd.f32 %v1709_v21, %v997_v44 }
0x1373   :  { %v1010_v18 = vadd.f32 %v1008_v2, %v999_v50 }
0x1375   :  { %v1019_v19 = vpop.permute.xlu1 %1018  ;;  %v1030_v43 = vpop.permute.xlu0 %1029 }
0x1376   :  { %v1021_v20 = vadd.f32 %v1019_v19, %v1010_v18 }
0x1378   :  { %v1032_v23 = vadd.f32 %v1030_v43, %v1021_v20 }
0x137a   :  { %v1041_v24 = vpop.permute.xlu1 %1040 }
0x137b   :  { %v1043_v25 = vadd.f32 %v1041_v24, %v1032_v23 }
0x137e   :  { %v1063_v32 = vpop.permute.xlu1 %1062 }
0x137f   :  { %v1052_v30 = vpop.permute.xlu0 %1051 }
0x1380   :  { %v1054_v31 = vadd.f32 %v1052_v30, %v1043_v25 }
0x1382   :  { %v1065_v40 = vadd.f32 %v1063_v32, %v1054_v31 }
0x1384   :  { %v1074_v61 = vpop.permute.xlu0 %1073 }
0x1385   :  { %v1076_v54 = vadd.f32 %v1074_v61, %v1065_v40 }
0x1387   :  { %v1239_v42 = vmul.f32 -1.442695, %v1076_v54 }
0x1389   :  { %1415 = vpow2.f32 %v1239_v42 }
0x1393   :  { %v1416_v45 = vpop.eup %1415 }
0x1394   :  { %v1080_v3 = vadd.f32 1.0, %v1416_v45 }
0x1396   :  { %1417 = vrcp.f32 %v1080_v3 }
0x13a0   :  { %v1418_v21 = vpop.eup %1417 }
0x13a1   :  { %v1083_v46 = vmul.f32 2.0, %v1418_v21  ;;  %v1088_v53 = vmul.f32 %v1418_v21, %v1086_v52 }
0x13a3   :  { %v1240_v17 = vadd.f32 -1.0, %v1083_v46 }
0x13a5   :  { %1090 = vrot.lane.b32.xlu1 %v1240_v17, %s1456_s26 }
0x1417   :  { %v1091_v47 = vpop.permute.xlu1 %1090 }
0x1418   :  { %v1093_v48 = vmul.f32 %v1418_v21, %v1091_v47 }
0x141a   :  { %1095 = vrot.lane.b32.xlu0 %v1093_v48, %s1457_s27 }
0x141e   :  { %1110 = vrot.lane.b32.xlu0 %v1421_v49, %s1467_s7 }
0x1422   :  { %1114 = vrot.lane.b32.xlu0 %v1532_v22, %s1468_s8 }
0x148c   :  { %v1096_v26 = vpop.permute.xlu0 %1095 }
0x148d   :  { %v1098_v56 = vadd.f32 %v1096_v26, %v1088_v53 }
0x148f   :  { %1419 = vtanh.f32 %v1098_v56  ;;  %1198 = vrot.lane.b32.xlu0 %v1098_v56, %s1468_s8 }
0x1490   :  { %v1111_v57 = vpop.permute.xlu0 %1110 }
0x1491   :  { %1267 = vmatpush3.msra.mxu1 %v1111_v57 }
0x1494   :  { %v1115_v63 = vpop.permute.xlu0 %1114 }
0x1499   :  { %v1420_v41 = vpop.eup %1419 }
0x149a   :  { %1101 = vrot.lane.b32.xlu1 %v1420_v41, %s1460_s28 }
0x1501   :  { %v1199_v55 = vpop.permute.xlu0 %1198 }
0x150c   :  { %v1102_v58 = vpop.permute.xlu1 %1101 }
0x150d   :  { %v1104_v60 = vmul.f32 %v1418_v21, %v1102_v58 }
0x150f   :  { %v1106_v62 = vrot.slane %v1104_v60, 4 }
0x1511   :  { %1107 = vrot.lane.b32.xlu1 %v1106_v62, %s1470_s1 }
0x1515   :  { %1192 = vrot.lane.b32.xlu1 %v1104_v60, %s1457_s27 }
0x1583   :  { %v1108_v22 = vpop.permute.xlu1 %1107 }
0x1584   :  { %1269 = vmatmul.mubr.msk.f32.vlgmr.msra.gmra.mrb[0].mxu1 %vm1117_vm6, %v1108_v22 }
0x1587   :  { %v1193_v27 = vpop.permute.xlu1 %1192 }
0x1657   :  { %v1186_v0 = vpop.f32.mrb[0].mxu1 }
0x1658   :  { %v1187_v4 = vadd.f32 %v1186_v0, %v1115_v63  ;;  %v1270_v10 = vpop.f32.mrb[1].mxu1 }
0x165a   :  { %1191 = vst.msk [vmem:[#allocation2] sm:$0xf] %vm1190_vm7, %v1187_v4 }
0x165b   :  { %1196 = vst.msk [vmem:[#allocation2 - $0x4] sm:$0xf0] %vm1195_vm8, %v1193_v27 }
0x165c   :  { %1202 = vst.msk [vmem:[#allocation2 - $0x4] sm:$0xf0] %vm1201_vm9, %v1199_v55 }
0x165d   :  { %1433 = shalt.err (!%p1430_p4)
}
0x165e   :  { %s1434_s14 = scalar_lea.hbm %s1850_s3, 64 }
0x165f   :  { %p1435_p5 = scmp.ne.s32.totalorder %s1850_s3, %s1434_s14  ;;  %p1438_p6 = scmp.lt.u32.totalorder %s1434_s14, %s1850_s3 }
0x1661   :  { %p1440_p7 = pnand %p1438_p6, %p1435_p5 }
0x1663   :  { %1443 = shalt.err (!%p1440_p7)
}
0x1664   :  { %1212 = dma.vmem_to_hbm [thread:$0]  %s1210_s10, 64, %s1850_s3, [#allocation3]  }
0x1665   :  { %1444 = dma.done.wait [#allocation3], 64  }
0x1666   :  { %1445 = vsyncadd [#allocation3], 4294967232 }
0x1667   :  { %1216 = vsyncpa [#allocation3], 1 }

</bundles_post_ra>
